<compile_context>
chip_gen: v5e
topology: v5e:2x2
jax: 0.10.0
libtpu: 0.0.40
codegen_flags: <defaults>
</compile_context>

<pallas_src>
import jax
import jax.numpy as jnp
from jax.experimental import pallas as pl
from jax.experimental.pallas import tpu as pltpu

EPS = 1e-5


def _adapter_kernel(x_ref, win_ref, wout_ref, bout_ref, bn1_ref, bn2_ref, o_ref):
    x = x_ref[...]                            # (N, F) f32 (kept f32 for residual)
    n, f = x.shape
    c = bn2_ref.shape[1]
    hw = f // c

    # ---- l_in on the MXU: bf16 operands, f32 accumulation.
    # Bias omitted: training-mode BatchNorm1d removes any per-feature constant.
    h = jnp.dot(x.astype(jnp.bfloat16), win_ref[...],
                preferred_element_type=jnp.float32)              # (N, Dp)

    # ---- bn1 (training mode): single-pass stats + fused scale/shift + relu.
    inv_n = 1.0 / n
    mu1 = jnp.sum(h, axis=0, keepdims=True) * inv_n              # (1, Dp)
    ex1 = jnp.sum(h * h, axis=0, keepdims=True) * inv_n          # E[h^2]
    p1 = bn1_ref[...]                                            # (2, Dp) = [gamma; beta]
    scale1 = p1[0:1, :] * jax.lax.rsqrt(ex1 - mu1 * mu1 + EPS)
    shift1 = p1[1:2, :] - mu1 * scale1
    h = jnp.maximum(h * scale1 + shift1, 0.0)

    # ---- l_out (+ bias) and residual.
    out = jnp.dot(h.astype(jnp.bfloat16), wout_ref[...],
                  preferred_element_type=jnp.float32)            # (N, F)
    y = x + out + bout_ref[...]

    # ---- bn2 = BatchNorm2d(C) + hardtanh.
    # Channel ci owns the contiguous, lane-aligned column block
    # [ci*HW, (ci+1)*HW) of the flattened layout; a small static loop keeps
    # the per-channel normalization a plain (1,1) broadcast (no gathers).
    inv_cnt = 1.0 / (n * hw)
    for ci in range(c):
        lo = ci * hw
        yc = y[:, lo:lo + hw]                                    # (N, HW)
        rows = jnp.sum(yc, axis=1, keepdims=True)                # (N, 1)
        rows2 = jnp.sum(yc * yc, axis=1, keepdims=True)
        mu = jnp.sum(rows, axis=0, keepdims=True) * inv_cnt      # (1, 1)
        ex2 = jnp.sum(rows2, axis=0, keepdims=True) * inv_cnt
        s = bn2_ref[0, ci] * jax.lax.rsqrt(ex2 - mu * mu + EPS)  # (1, 1)
        t = bn2_ref[1, ci] - mu * s
        o_ref[:, lo:lo + hw] = jnp.clip(yc * s + t, -1.0, 1.0).astype(o_ref.dtype)


def bottleneck_adapter_forward(x, w_in, b_in, w_out, b_out, g1, be1, g2, be2):
    """x: (N, C, H, W).  w_in: (D, F), b_in: (D,), w_out: (F, D), b_out: (F,),
    g1/be1: (D,) BN1d affine, g2/be2: (C,) BN2d affine.  Returns (N, C, H, W)."""
    N, C, H, W = x.shape
    F = C * H * W
    D = w_in.shape[0]
    del b_in  # exactly cancelled by the training-mode BatchNorm1d after l_in

    x2 = x.reshape(N, F).astype(jnp.float32)

    # Pad the bottleneck dim to a 128-lane multiple (exact, see header).
    Dp = ((D + 127) // 128) * 128
    win_t = jnp.zeros((F, Dp), jnp.bfloat16).at[:, :D].set(
        w_in.T.astype(jnp.bfloat16))
    wout_t = jnp.zeros((Dp, F), jnp.bfloat16).at[:D, :].set(
        w_out.T.astype(jnp.bfloat16))
    bn1p = jnp.zeros((2, Dp), jnp.float32)
    bn1p = bn1p.at[0, :].set(1.0).at[0, :D].set(g1.astype(jnp.float32))
    bn1p = bn1p.at[1, :D].set(be1.astype(jnp.float32))
    bn2p = jnp.stack([g2.astype(jnp.float32), be2.astype(jnp.float32)])   # (2, C)
    bout2 = b_out.reshape(1, F).astype(jnp.float32)

    vmem = lambda shape: pl.BlockSpec(shape, lambda i: (0,) * len(shape))

    y2 = pl.pallas_call(
        _adapter_kernel,
        out_shape=jax.ShapeDtypeStruct((N, F), x2.dtype),
        grid=(1,),  # whole problem resident: BN batch stats need the full batch
        in_specs=[
            vmem((N, F)),       # x (f32, reused for the residual)
            vmem((F, Dp)),      # W_in^T  (bf16)
            vmem((Dp, F)),      # W_out^T (bf16)
            vmem((1, F)),       # b_out
            vmem((2, Dp)),      # bn1 gamma/beta
            pl.BlockSpec(memory_space=pltpu.MemorySpace.SMEM),  # bn2 gamma/beta
        ],
        out_specs=vmem((N, F)),
        compiler_params=pltpu.CompilerParams(
            dimension_semantics=("arbitrary",)),
    )(x2, win_t, wout_t, bout2, bn1p, bn2p)
    return y2.reshape(N, C, H, W)


def reference_forward(x, w_in, b_in, w_out, b_out, g1, be1, g2, be2):
    """Pure-JAX reference of the PyTorch training-mode forward; matmul operands
    rounded to bf16 (f32 accumulation) to match the kernel's MXU path."""
    N, C, H, W = x.shape
    F = C * H * W
    xf = x.reshape(N, F).astype(jnp.float32)
    h = jnp.dot(xf.astype(jnp.bfloat16), w_in.T.astype(jnp.bfloat16),
                preferred_element_type=jnp.float32) + b_in
    mu1 = h.mean(0)
    v1 = ((h - mu1) ** 2).mean(0)
    h = (h - mu1) / jnp.sqrt(v1 + EPS) * g1 + be1
    h = jnp.maximum(h, 0.0)
    out = jnp.dot(h.astype(jnp.bfloat16), w_out.T.astype(jnp.bfloat16),
                  preferred_element_type=jnp.float32) + b_out
    y = (xf + out).reshape(N, C, H, W)
    mu2 = y.mean(axis=(0, 2, 3), keepdims=True)
    v2 = ((y - mu2) ** 2).mean(axis=(0, 2, 3), keepdims=True)
    y = (y - mu2) / jnp.sqrt(v2 + EPS) * g2.reshape(1, C, 1, 1) \
        + be2.reshape(1, C, 1, 1)
    return jnp.clip(y, -1.0, 1.0)


if __name__ == "__main__":
    N, C, H, W = 8, 4, 16, 16     # batch, channels, spatial  -> F = 1024
    D = 128                       # bottleneck ("downsample") width
    F = C * H * W

    key = jax.random.PRNGKey(0)
    kx, kwi, kbi, kwo, kbo = jax.random.split(key, 5)

    x = jax.random.normal(kx, (N, C, H, W), dtype=jnp.float32)
    w_in = jax.random.normal(kwi, (D, F), dtype=jnp.float32) * 0.1
    b_in = jax.random.normal(kbi, (D,), dtype=jnp.float32) * 0.1
    w_out = jax.random.normal(kwo, (F, D), dtype=jnp.float32) * 0.1
    b_out = jax.random.normal(kbo, (F,), dtype=jnp.float32) * 0.1
    # Fresh BatchNorm affine defaults: weight = 1, bias = 0.
    g1, be1 = jnp.ones((D,), jnp.float32), jnp.zeros((D,), jnp.float32)
    g2, be2 = jnp.ones((C,), jnp.float32), jnp.zeros((C,), jnp.float32)

    y = bottleneck_adapter_forward(x, w_in, b_in, w_out, b_out, g1, be1, g2, be2)
    y = jax.block_until_ready(y)

    y_ref = reference_forward(x, w_in, b_in, w_out, b_out, g1, be1, g2, be2)
    assert y.shape == (N, C, H, W)
    max_err = float(jnp.max(jnp.abs(y - y_ref)))
    assert jnp.allclose(y, y_ref, atol=1e-3, rtol=1e-3), \
        f"mismatch vs JAX reference (max abs err {max_err})"

    print("KERNEL_OK")
</pallas_src>

<mosaic_0001>
module attributes {stable_mosaic.version = 11 : i64} {
  func.func @_adapter_kernel(%arg0: i32, %arg1: memref<8x1024xf32, #tpu.memory_space<vmem>>, %arg2: memref<1024x128xbf16, #tpu.memory_space<vmem>>, %arg3: memref<128x1024xbf16, #tpu.memory_space<vmem>>, %arg4: memref<1x1024xf32, #tpu.memory_space<vmem>>, %arg5: memref<2x128xf32, #tpu.memory_space<vmem>>, %arg6: memref<2x4xf32, #tpu.memory_space<smem>>, %arg7: memref<8x1024xf32, #tpu.memory_space<vmem>>) attributes {dimension_semantics = [#tpu.dimension_semantics<arbitrary>], iteration_bounds = array<i64: 1>, scalar_prefetch = 0 : i64, scratch_operands = 0 : i64, tpu.core_type = #tpu.core_type<tc>, window_params = [{pipeline_mode = #tpu.pipeline_mode<synchronous>, transform_indices = @transform_0, window_bounds = array<i64: 8, 1024>}, {pipeline_mode = #tpu.pipeline_mode<synchronous>, transform_indices = @transform_1, window_bounds = array<i64: 1024, 128>}, {pipeline_mode = #tpu.pipeline_mode<synchronous>, transform_indices = @transform_2, window_bounds = array<i64: 128, 1024>}, {pipeline_mode = #tpu.pipeline_mode<synchronous>, transform_indices = @transform_3, window_bounds = array<i64: 1, 1024>}, {pipeline_mode = #tpu.pipeline_mode<synchronous>, transform_indices = @transform_4, window_bounds = array<i64: 2, 128>}, {transform_indices = @transform_5, window_bounds = array<i64: 2, 4>}, {pipeline_mode = #tpu.pipeline_mode<synchronous>, transform_indices = @transform_6, window_bounds = array<i64: 8, 1024>}]} {
    %c0 = arith.constant 0 : index
    %c0_0 = arith.constant 0 : index
    %0 = vector.load %arg1[%c0, %c0_0] : memref<8x1024xf32, #tpu.memory_space<vmem>>, vector<8x1024xf32>
    %1 = arith.truncf %0 : vector<8x1024xf32> to vector<8x1024xbf16>
    %c0_1 = arith.constant 0 : index
    %c0_2 = arith.constant 0 : index
    %2 = vector.load %arg2[%c0_1, %c0_2] : memref<1024x128xbf16, #tpu.memory_space<vmem>>, vector<1024x128xbf16>
    %cst = arith.constant dense<0.000000e+00> : vector<8x128xf32>
    %3 = tpu.matmul %1, %2, %cst {dimension_numbers = #tpu.dot_dimension_numbers<[1], [0], [0], [1], [0, 0, 1, 1], [], []>} : vector<8x1024xbf16>, vector<1024x128xbf16>, vector<8x128xf32> -> vector<8x128xf32>
    %cst_3 = arith.constant dense<0.000000e+00> : vector<128xf32>
    %4 = vector.multi_reduction <add>, %3, %cst_3 [0] : vector<8x128xf32> to vector<128xf32>
    %5 = vector.shape_cast %4 : vector<128xf32> to vector<1x128xf32>
    %cst_4 = arith.constant 1.250000e-01 : f32
    %6 = vector.broadcast %cst_4 : f32 to vector<1x128xf32>
    %7 = arith.mulf %5, %6 : vector<1x128xf32>
    %8 = arith.mulf %3, %3 : vector<8x128xf32>
    %cst_5 = arith.constant dense<0.000000e+00> : vector<128xf32>
    %9 = vector.multi_reduction <add>, %8, %cst_5 [0] : vector<8x128xf32> to vector<128xf32>
    %10 = vector.shape_cast %9 : vector<128xf32> to vector<1x128xf32>
    %cst_6 = arith.constant 1.250000e-01 : f32
    %11 = vector.broadcast %cst_6 : f32 to vector<1x128xf32>
    %12 = arith.mulf %10, %11 : vector<1x128xf32>
    %c0_7 = arith.constant 0 : index
    %c0_8 = arith.constant 0 : index
    %13 = vector.load %arg5[%c0_7, %c0_8] : memref<2x128xf32, #tpu.memory_space<vmem>>, vector<2x128xf32>
    %14 = vector.extract_strided_slice %13 {offsets = [0, 0], sizes = [1, 128], strides = [1, 1]} : vector<2x128xf32> to vector<1x128xf32>
    %15 = arith.mulf %7, %7 : vector<1x128xf32>
    %16 = arith.subf %12, %15 : vector<1x128xf32>
    %cst_9 = arith.constant 9.99999974E-6 : f32
    %17 = vector.broadcast %cst_9 : f32 to vector<1x128xf32>
    %18 = arith.addf %16, %17 : vector<1x128xf32>
    %19 = math.rsqrt %18 : vector<1x128xf32>
    %20 = arith.mulf %14, %19 : vector<1x128xf32>
    %21 = vector.extract_strided_slice %13 {offsets = [1, 0], sizes = [1, 128], strides = [1, 1]} : vector<2x128xf32> to vector<1x128xf32>
    %22 = arith.mulf %7, %20 : vector<1x128xf32>
    %23 = arith.subf %21, %22 : vector<1x128xf32>
    %24 = vector.broadcast %20 : vector<1x128xf32> to vector<8x128xf32>
    %25 = arith.mulf %3, %24 : vector<8x128xf32>
    %26 = vector.broadcast %23 : vector<1x128xf32> to vector<8x128xf32>
    %27 = arith.addf %25, %26 : vector<8x128xf32>
    %cst_10 = arith.constant 0.000000e+00 : f32
    %28 = vector.broadcast %cst_10 : f32 to vector<8x128xf32>
    %29 = arith.maximumf %27, %28 : vector<8x128xf32>
    %30 = arith.truncf %29 : vector<8x128xf32> to vector<8x128xbf16>
    %c0_11 = arith.constant 0 : index
    %c0_12 = arith.constant 0 : index
    %31 = vector.load %arg3[%c0_11, %c0_12] : memref<128x1024xbf16, #tpu.memory_space<vmem>>, vector<128x1024xbf16>
    %cst_13 = arith.constant dense<0.000000e+00> : vector<8x1024xf32>
    %32 = tpu.matmul %30, %31, %cst_13 {dimension_numbers = #tpu.dot_dimension_numbers<[1], [0], [0], [1], [0, 0, 1, 1], [], []>} : vector<8x128xbf16>, vector<128x1024xbf16>, vector<8x1024xf32> -> vector<8x1024xf32>
    %33 = arith.addf %0, %32 : vector<8x1024xf32>
    %c0_14 = arith.constant 0 : index
    %c0_15 = arith.constant 0 : index
    %34 = vector.load %arg4[%c0_14, %c0_15] : memref<1x1024xf32, #tpu.memory_space<vmem>>, vector<1x1024xf32>
    %35 = vector.broadcast %34 : vector<1x1024xf32> to vector<8x1024xf32>
    %36 = arith.addf %33, %35 : vector<8x1024xf32>
    %37 = vector.extract_strided_slice %36 {offsets = [0, 0], sizes = [8, 256], strides = [1, 1]} : vector<8x1024xf32> to vector<8x256xf32>
    %cst_16 = arith.constant dense<0.000000e+00> : vector<8xf32>
    %38 = vector.multi_reduction <add>, %37, %cst_16 [1] : vector<8x256xf32> to vector<8xf32>
    %39 = vector.shape_cast %38 : vector<8xf32> to vector<8x1xf32>
    %40 = arith.mulf %37, %37 : vector<8x256xf32>
    %cst_17 = arith.constant dense<0.000000e+00> : vector<8xf32>
    %41 = vector.multi_reduction <add>, %40, %cst_17 [1] : vector<8x256xf32> to vector<8xf32>
    %42 = vector.shape_cast %41 : vector<8xf32> to vector<8x1xf32>
    %cst_18 = arith.constant dense<0.000000e+00> : vector<1xf32>
    %43 = vector.multi_reduction <add>, %39, %cst_18 [0] : vector<8x1xf32> to vector<1xf32>
    %44 = vector.shape_cast %43 : vector<1xf32> to vector<1x1xf32>
    %cst_19 = arith.constant 4.8828125E-4 : f32
    %45 = vector.broadcast %cst_19 : f32 to vector<1x1xf32>
    %46 = arith.mulf %44, %45 : vector<1x1xf32>
    %cst_20 = arith.constant dense<0.000000e+00> : vector<1xf32>
    %47 = vector.multi_reduction <add>, %42, %cst_20 [0] : vector<8x1xf32> to vector<1xf32>
    %48 = vector.shape_cast %47 : vector<1xf32> to vector<1x1xf32>
    %cst_21 = arith.constant 4.8828125E-4 : f32
    %49 = vector.broadcast %cst_21 : f32 to vector<1x1xf32>
    %50 = arith.mulf %48, %49 : vector<1x1xf32>
    %c0_22 = arith.constant 0 : index
    %c0_23 = arith.constant 0 : index
    %51 = memref.load %arg6[%c0_22, %c0_23] : memref<2x4xf32, #tpu.memory_space<smem>>
    %52 = arith.mulf %46, %46 : vector<1x1xf32>
    %53 = arith.subf %50, %52 : vector<1x1xf32>
    %cst_24 = arith.constant 9.99999974E-6 : f32
    %54 = vector.broadcast %cst_24 : f32 to vector<1x1xf32>
    %55 = arith.addf %53, %54 : vector<1x1xf32>
    %56 = math.rsqrt %55 : vector<1x1xf32>
    %57 = vector.broadcast %51 : f32 to vector<1x1xf32>
    %58 = arith.mulf %57, %56 : vector<1x1xf32>
    %c1 = arith.constant 1 : index
    %c0_25 = arith.constant 0 : index
    %59 = memref.load %arg6[%c1, %c0_25] : memref<2x4xf32, #tpu.memory_space<smem>>
    %60 = arith.mulf %46, %58 : vector<1x1xf32>
    %61 = vector.broadcast %59 : f32 to vector<1x1xf32>
    %62 = arith.subf %61, %60 : vector<1x1xf32>
    %63 = vector.broadcast %58 : vector<1x1xf32> to vector<8x256xf32>
    %64 = arith.mulf %37, %63 : vector<8x256xf32>
    %65 = vector.broadcast %62 : vector<1x1xf32> to vector<8x256xf32>
    %66 = arith.addf %64, %65 : vector<8x256xf32>
    %cst_26 = arith.constant -1.000000e+00 : f32
    %cst_27 = arith.constant 1.000000e+00 : f32
    %67 = vector.broadcast %cst_26 : f32 to vector<8x256xf32>
    %68 = arith.maximumf %67, %66 : vector<8x256xf32>
    %69 = vector.broadcast %cst_27 : f32 to vector<8x256xf32>
    %70 = arith.minimumf %69, %68 : vector<8x256xf32>
    %c0_28 = arith.constant 0 : index
    %c0_29 = arith.constant 0 : index
    %71 = vector.load %arg7[%c0_28, %c0_29] : memref<8x1024xf32, #tpu.memory_space<vmem>>, vector<8x256xf32>
    tpu.vector_store %arg7[%c0_28, %c0_29], %70 {strides = array<i32>} : memref<8x1024xf32, #tpu.memory_space<vmem>>, vector<8x256xf32>,
    %72 = vector.extract_strided_slice %36 {offsets = [0, 256], sizes = [8, 256], strides = [1, 1]} : vector<8x1024xf32> to vector<8x256xf32>
    %cst_30 = arith.constant dense<0.000000e+00> : vector<8xf32>
    %73 = vector.multi_reduction <add>, %72, %cst_30 [1] : vector<8x256xf32> to vector<8xf32>
    %74 = vector.shape_cast %73 : vector<8xf32> to vector<8x1xf32>
    %75 = arith.mulf %72, %72 : vector<8x256xf32>
    %cst_31 = arith.constant dense<0.000000e+00> : vector<8xf32>
    %76 = vector.multi_reduction <add>, %75, %cst_31 [1] : vector<8x256xf32> to vector<8xf32>
    %77 = vector.shape_cast %76 : vector<8xf32> to vector<8x1xf32>
    %cst_32 = arith.constant dense<0.000000e+00> : vector<1xf32>
    %78 = vector.multi_reduction <add>, %74, %cst_32 [0] : vector<8x1xf32> to vector<1xf32>
    %79 = vector.shape_cast %78 : vector<1xf32> to vector<1x1xf32>
    %cst_33 = arith.constant 4.8828125E-4 : f32
    %80 = vector.broadcast %cst_33 : f32 to vector<1x1xf32>
    %81 = arith.mulf %79, %80 : vector<1x1xf32>
    %cst_34 = arith.constant dense<0.000000e+00> : vector<1xf32>
    %82 = vector.multi_reduction <add>, %77, %cst_34 [0] : vector<8x1xf32> to vector<1xf32>
    %83 = vector.shape_cast %82 : vector<1xf32> to vector<1x1xf32>
    %cst_35 = arith.constant 4.8828125E-4 : f32
    %84 = vector.broadcast %cst_35 : f32 to vector<1x1xf32>
    %85 = arith.mulf %83, %84 : vector<1x1xf32>
    %c0_36 = arith.constant 0 : index
    %c1_37 = arith.constant 1 : index
    %86 = memref.load %arg6[%c0_36, %c1_37] : memref<2x4xf32, #tpu.memory_space<smem>>
    %87 = arith.mulf %81, %81 : vector<1x1xf32>
    %88 = arith.subf %85, %87 : vector<1x1xf32>
    %cst_38 = arith.constant 9.99999974E-6 : f32
    %89 = vector.broadcast %cst_38 : f32 to vector<1x1xf32>
    %90 = arith.addf %88, %89 : vector<1x1xf32>
    %91 = math.rsqrt %90 : vector<1x1xf32>
    %92 = vector.broadcast %86 : f32 to vector<1x1xf32>
    %93 = arith.mulf %92, %91 : vector<1x1xf32>
    %c1_39 = arith.constant 1 : index
    %c1_40 = arith.constant 1 : index
    %94 = memref.load %arg6[%c1_39, %c1_40] : memref<2x4xf32, #tpu.memory_space<smem>>
    %95 = arith.mulf %81, %93 : vector<1x1xf32>
    %96 = vector.broadcast %94 : f32 to vector<1x1xf32>
    %97 = arith.subf %96, %95 : vector<1x1xf32>
    %98 = vector.broadcast %93 : vector<1x1xf32> to vector<8x256xf32>
    %99 = arith.mulf %72, %98 : vector<8x256xf32>
    %100 = vector.broadcast %97 : vector<1x1xf32> to vector<8x256xf32>
    %101 = arith.addf %99, %100 : vector<8x256xf32>
    %cst_41 = arith.constant -1.000000e+00 : f32
    %cst_42 = arith.constant 1.000000e+00 : f32
    %102 = vector.broadcast %cst_41 : f32 to vector<8x256xf32>
    %103 = arith.maximumf %102, %101 : vector<8x256xf32>
    %104 = vector.broadcast %cst_42 : f32 to vector<8x256xf32>
    %105 = arith.minimumf %104, %103 : vector<8x256xf32>
    %c0_43 = arith.constant 0 : index
    %c256 = arith.constant 256 : index
    %106 = vector.load %arg7[%c0_43, %c256] : memref<8x1024xf32, #tpu.memory_space<vmem>>, vector<8x256xf32>
    tpu.vector_store %arg7[%c0_43, %c256], %105 {strides = array<i32>} : memref<8x1024xf32, #tpu.memory_space<vmem>>, vector<8x256xf32>,
    %107 = vector.extract_strided_slice %36 {offsets = [0, 512], sizes = [8, 256], strides = [1, 1]} : vector<8x1024xf32> to vector<8x256xf32>
    %cst_44 = arith.constant dense<0.000000e+00> : vector<8xf32>
    %108 = vector.multi_reduction <add>, %107, %cst_44 [1] : vector<8x256xf32> to vector<8xf32>
    %109 = vector.shape_cast %108 : vector<8xf32> to vector<8x1xf32>
    %110 = arith.mulf %107, %107 : vector<8x256xf32>
    %cst_45 = arith.constant dense<0.000000e+00> : vector<8xf32>
    %111 = vector.multi_reduction <add>, %110, %cst_45 [1] : vector<8x256xf32> to vector<8xf32>
    %112 = vector.shape_cast %111 : vector<8xf32> to vector<8x1xf32>
    %cst_46 = arith.constant dense<0.000000e+00> : vector<1xf32>
    %113 = vector.multi_reduction <add>, %109, %cst_46 [0] : vector<8x1xf32> to vector<1xf32>
    %114 = vector.shape_cast %113 : vector<1xf32> to vector<1x1xf32>
    %cst_47 = arith.constant 4.8828125E-4 : f32
    %115 = vector.broadcast %cst_47 : f32 to vector<1x1xf32>
    %116 = arith.mulf %114, %115 : vector<1x1xf32>
    %cst_48 = arith.constant dense<0.000000e+00> : vector<1xf32>
    %117 = vector.multi_reduction <add>, %112, %cst_48 [0] : vector<8x1xf32> to vector<1xf32>
    %118 = vector.shape_cast %117 : vector<1xf32> to vector<1x1xf32>
    %cst_49 = arith.constant 4.8828125E-4 : f32
    %119 = vector.broadcast %cst_49 : f32 to vector<1x1xf32>
    %120 = arith.mulf %118, %119 : vector<1x1xf32>
    %c0_50 = arith.constant 0 : index
    %c2 = arith.constant 2 : index
    %121 = memref.load %arg6[%c0_50, %c2] : memref<2x4xf32, #tpu.memory_space<smem>>
    %122 = arith.mulf %116, %116 : vector<1x1xf32>
    %123 = arith.subf %120, %122 : vector<1x1xf32>
    %cst_51 = arith.constant 9.99999974E-6 : f32
    %124 = vector.broadcast %cst_51 : f32 to vector<1x1xf32>
    %125 = arith.addf %123, %124 : vector<1x1xf32>
    %126 = math.rsqrt %125 : vector<1x1xf32>
    %127 = vector.broadcast %121 : f32 to vector<1x1xf32>
    %128 = arith.mulf %127, %126 : vector<1x1xf32>
    %c1_52 = arith.constant 1 : index
    %c2_53 = arith.constant 2 : index
    %129 = memref.load %arg6[%c1_52, %c2_53] : memref<2x4xf32, #tpu.memory_space<smem>>
    %130 = arith.mulf %116, %128 : vector<1x1xf32>
    %131 = vector.broadcast %129 : f32 to vector<1x1xf32>
    %132 = arith.subf %131, %130 : vector<1x1xf32>
    %133 = vector.broadcast %128 : vector<1x1xf32> to vector<8x256xf32>
    %134 = arith.mulf %107, %133 : vector<8x256xf32>
    %135 = vector.broadcast %132 : vector<1x1xf32> to vector<8x256xf32>
    %136 = arith.addf %134, %135 : vector<8x256xf32>
    %cst_54 = arith.constant -1.000000e+00 : f32
    %cst_55 = arith.constant 1.000000e+00 : f32
    %137 = vector.broadcast %cst_54 : f32 to vector<8x256xf32>
    %138 = arith.maximumf %137, %136 : vector<8x256xf32>
    %139 = vector.broadcast %cst_55 : f32 to vector<8x256xf32>
    %140 = arith.minimumf %139, %138 : vector<8x256xf32>
    %c0_56 = arith.constant 0 : index
    %c512 = arith.constant 512 : index
    %141 = vector.load %arg7[%c0_56, %c512] : memref<8x1024xf32, #tpu.memory_space<vmem>>, vector<8x256xf32>
    tpu.vector_store %arg7[%c0_56, %c512], %140 {strides = array<i32>} : memref<8x1024xf32, #tpu.memory_space<vmem>>, vector<8x256xf32>,
    %142 = vector.extract_strided_slice %36 {offsets = [0, 768], sizes = [8, 256], strides = [1, 1]} : vector<8x1024xf32> to vector<8x256xf32>
    %cst_57 = arith.constant dense<0.000000e+00> : vector<8xf32>
    %143 = vector.multi_reduction <add>, %142, %cst_57 [1] : vector<8x256xf32> to vector<8xf32>
    %144 = vector.shape_cast %143 : vector<8xf32> to vector<8x1xf32>
    %145 = arith.mulf %142, %142 : vector<8x256xf32>
    %cst_58 = arith.constant dense<0.000000e+00> : vector<8xf32>
    %146 = vector.multi_reduction <add>, %145, %cst_58 [1] : vector<8x256xf32> to vector<8xf32>
    %147 = vector.shape_cast %146 : vector<8xf32> to vector<8x1xf32>
    %cst_59 = arith.constant dense<0.000000e+00> : vector<1xf32>
    %148 = vector.multi_reduction <add>, %144, %cst_59 [0] : vector<8x1xf32> to vector<1xf32>
    %149 = vector.shape_cast %148 : vector<1xf32> to vector<1x1xf32>
    %cst_60 = arith.constant 4.8828125E-4 : f32
    %150 = vector.broadcast %cst_60 : f32 to vector<1x1xf32>
    %151 = arith.mulf %149, %150 : vector<1x1xf32>
    %cst_61 = arith.constant dense<0.000000e+00> : vector<1xf32>
    %152 = vector.multi_reduction <add>, %147, %cst_61 [0] : vector<8x1xf32> to vector<1xf32>
    %153 = vector.shape_cast %152 : vector<1xf32> to vector<1x1xf32>
    %cst_62 = arith.constant 4.8828125E-4 : f32
    %154 = vector.broadcast %cst_62 : f32 to vector<1x1xf32>
    %155 = arith.mulf %153, %154 : vector<1x1xf32>
    %c0_63 = arith.constant 0 : index
    %c3 = arith.constant 3 : index
    %156 = memref.load %arg6[%c0_63, %c3] : memref<2x4xf32, #tpu.memory_space<smem>>
    %157 = arith.mulf %151, %151 : vector<1x1xf32>
    %158 = arith.subf %155, %157 : vector<1x1xf32>
    %cst_64 = arith.constant 9.99999974E-6 : f32
    %159 = vector.broadcast %cst_64 : f32 to vector<1x1xf32>
    %160 = arith.addf %158, %159 : vector<1x1xf32>
    %161 = math.rsqrt %160 : vector<1x1xf32>
    %162 = vector.broadcast %156 : f32 to vector<1x1xf32>
    %163 = arith.mulf %162, %161 : vector<1x1xf32>
    %c1_65 = arith.constant 1 : index
    %c3_66 = arith.constant 3 : index
    %164 = memref.load %arg6[%c1_65, %c3_66] : memref<2x4xf32, #tpu.memory_space<smem>>
    %165 = arith.mulf %151, %163 : vector<1x1xf32>
    %166 = vector.broadcast %164 : f32 to vector<1x1xf32>
    %167 = arith.subf %166, %165 : vector<1x1xf32>
    %168 = vector.broadcast %163 : vector<1x1xf32> to vector<8x256xf32>
    %169 = arith.mulf %142, %168 : vector<8x256xf32>
    %170 = vector.broadcast %167 : vector<1x1xf32> to vector<8x256xf32>
    %171 = arith.addf %169, %170 : vector<8x256xf32>
    %cst_67 = arith.constant -1.000000e+00 : f32
    %cst_68 = arith.constant 1.000000e+00 : f32
    %172 = vector.broadcast %cst_67 : f32 to vector<8x256xf32>
    %173 = arith.maximumf %172, %171 : vector<8x256xf32>
    %174 = vector.broadcast %cst_68 : f32 to vector<8x256xf32>
    %175 = arith.minimumf %174, %173 : vector<8x256xf32>
    %c0_69 = arith.constant 0 : index
    %c768 = arith.constant 768 : index
    %176 = vector.load %arg7[%c0_69, %c768] : memref<8x1024xf32, #tpu.memory_space<vmem>>, vector<8x256xf32>
    tpu.vector_store %arg7[%c0_69, %c768], %175 {strides = array<i32>} : memref<8x1024xf32, #tpu.memory_space<vmem>>, vector<8x256xf32>,
    return
  }
  func.func @transform_0(%arg0: i32) -> (i32, i32) {
    %c0_i32 = arith.constant 0 : i32
    %c0_i32_0 = arith.constant 0 : i32
    %c0_i32_1 = arith.constant 0 : i32
    return %c0_i32, %c0_i32_0 : i32, i32
  }
  func.func @transform_1(%arg0: i32) -> (i32, i32) {
    %c0_i32 = arith.constant 0 : i32
    %c0_i32_0 = arith.constant 0 : i32
    %c0_i32_1 = arith.constant 0 : i32
    return %c0_i32, %c0_i32_0 : i32, i32
  }
  func.func @transform_2(%arg0: i32) -> (i32, i32) {
    %c0_i32 = arith.constant 0 : i32
    %c0_i32_0 = arith.constant 0 : i32
    %c0_i32_1 = arith.constant 0 : i32
    return %c0_i32, %c0_i32_0 : i32, i32
  }
  func.func @transform_3(%arg0: i32) -> (i32, i32) {
    %c0_i32 = arith.constant 0 : i32
    %c0_i32_0 = arith.constant 0 : i32
    %c0_i32_1 = arith.constant 0 : i32
    return %c0_i32, %c0_i32_0 : i32, i32
  }
  func.func @transform_4(%arg0: i32) -> (i32, i32) {
    %c0_i32 = arith.constant 0 : i32
    %c0_i32_0 = arith.constant 0 : i32
    %c0_i32_1 = arith.constant 0 : i32
    return %c0_i32, %c0_i32_0 : i32, i32
  }
  func.func @transform_5(%arg0: i32) -> (i32, i32) {
    %c0_i32 = arith.constant 0 : i32
    %c0_i32_0 = arith.constant 0 : i32
    %c0_i32_1 = arith.constant 0 : i32
    return %c0_i32, %c0_i32_0 : i32, i32
  }
  func.func @transform_6(%arg0: i32) -> (i32, i32) {
    %c0_i32 = arith.constant 0 : i32
    %c0_i32_0 = arith.constant 0 : i32
    %c0_i32_1 = arith.constant 0 : i32
    return %c0_i32, %c0_i32_0 : i32, i32
  }
}

</mosaic_0001>

<bundles_post_ra>
// kernel: tpu_custom_call.1
= control target key start
LH: loop header
LB: loop body
LE: loop exit
PB: predicated region body
PF: predicated region fallthrough
CT: control target
= control target key end

     0   :  { %11 = vsyncpa [#allocation3], 0  ;;  %s2543_s0 = inlined_call_operand.hbm [shape: f32[8,1024], index: 0, kind: input, shape index: {}]   ;;  %s2544_s1 = inlined_call_operand.hbm [shape: bf16[1024,128], index: 1, kind: input, shape index: {}]   ;;  %s2545_s2 = inlined_call_operand.hbm [shape: bf16[128,1024], index: 2, kind: input, shape index: {}]   ;;  %s2546_s3 = inlined_call_operand.hbm [shape: f32[1,1024], index: 3, kind: input, shape index: {}]   ;;  %s2547_s4 = inlined_call_operand.vmem [shape: f32[2,128], index: 4, kind: input, shape index: {}]   ;;  %s2548_s5 = inlined_call_operand.vmem [shape: f32[2,4], index: 5, kind: input, shape index: {}]   ;;  %s2549_s6 = inlined_call_operand.hbm [shape: f32[8,1024], index: 6, kind: output, shape index: {}]  }
   0x1   :  { %12 = vsyncpa [#allocation7], 0 }
   0x2   :  { %13 = vsyncpa [#allocation10], 0 }
   0x3   :  { %14 = vsyncpa [#allocation5], 0  ;;  %s31_s23 = sshll.u32 %s2544_s1, 4  ;;  %s32_s23 = int_to_ptr.hbm [resolvable:$true] %s31_s23 }
   0x4   :  { %15 = vsyncpa [#allocation4], 0  ;;  %s2336_s24 = smov [#allocation6]   ;;  %s21_s28 = sshll.u32 %s2543_s0, 4  ;;  %s22_s28 = int_to_ptr.hbm [resolvable:$true] %s21_s28 }
   0x5   :  { %s33_s25 = sshll.u32 %s2336_s24, 4  ;;  %s2337_s29 = smov 64   ;;  %s34_s25 = int_to_ptr.vmem [resolvable:$true] %s33_s25 }
   0x6   :  { %s2338_s30 = smov 4   ;;  %s2339_s7 = smov [#allocation2]  }
   0x7   :  { %39 = dma.hbm_to_vmem [thread:$0]  %s32_s23, 8192, %s34_s25, [#allocation7], %s2337_s29, %s2337_s29, %s2338_s30  }
   0x8   :  { %s23_s8 = sshll.u32 %s2339_s7, 4  ;;  %s44_s11 = sshll.u32 %s2545_s2, 4  ;;  %s24_s8 = int_to_ptr.vmem [resolvable:$true] %s23_s8  ;;  %s45_s11 = int_to_ptr.hbm [resolvable:$true] %s44_s11 }
   0x9   :  { %26 = dma.hbm_to_vmem [thread:$0]  %s22_s28, 1024, %s24_s8, [#allocation3]  }
   0xa   :  { %s2340_s1 = smov [#allocation8]   ;;  %s58_s0 = sshll.u32 %s2546_s3, 4  ;;  %s59_s0 = int_to_ptr.hbm [resolvable:$true] %s58_s0 }
   0xb   :  { %s46_s12 = sshll.u32 %s2340_s1, 4  ;;  %s2341_s15 = smov 512   ;;  %s47_s12 = int_to_ptr.vmem [resolvable:$true] %s46_s12 }
   0xc   :  { %s2342_s16 = smov 32   ;;  %s2343_s17 = smov [#allocation9]  }
   0xd   :  { %52 = dma.hbm_to_vmem [thread:$0]  %s45_s11, 8192, %s47_s12, [#allocation7], %s2341_s15, %s2341_s15, %s2342_s16  }
   0xe   :  { %s60_s18 = sshll.u32 %s2343_s17, 4  ;;  %s71_s2 = sshll.u32 %s2548_s5, 4  ;;  %s61_s18 = int_to_ptr.vmem [resolvable:$true] %s60_s18  ;;  %s72_s2 = int_to_ptr.vmem [resolvable:$true] %s71_s2 }
   0xf   :  { %63 = dma.hbm_to_vmem [thread:$0]  %s59_s0, 128, %s61_s18, [#allocation10]  }
  0x10   :  { %s2344_s21 = smov [#allocation11]  }
  0x11   :  { %74 = dma.vmem_to_smem %s72_s2, 32, %s2344_s21, [#allocation5]  }
  0x12   :  { %2326 = dma.done.wait [#allocation3], 1024  }
  0x13   :  { %2327 = vsyncadd [#allocation3], 4294966272 }
  0x14   :  { %2328 = dma.done.wait [#allocation7], 16384  }
  0x15   :  { %2329 = vsyncadd [#allocation7], 4294950912 }
  0x16   :  { %2330 = dma.done.wait [#allocation10], 128  }
  0x17   :  { %2331 = vsyncadd [#allocation10], 4294967168 }
  0x18   :  { %2332 = dma.done.wait [#allocation5], 32  }
  0x19   :  { %2333 = vsyncadd [#allocation5], 4294967264 }
  0x1a   :  { %95 = sfence }
  0x1b   :  { %v2053_v0 = vld [vmem:[#allocation6 + $0x38] sm:$0xff]  ;;  %v2052_v4 = vld [vmem:[#allocation6 + $0x30] sm:$0xff]  ;;  %v2051_v8 = vld [vmem:[#allocation6 + $0x28] sm:$0xff]  ;;  %s2510_s22 = sld [smem:[#allocation11 + $0x80]]  ;;  %s2345_s29 = smov [#allocation12]  }
  0x1c   :  { %v2061_v1 = vld [vmem:[#allocation6 + $0x78] sm:$0xff]  ;;  %624 = vmatpush.bf16.msra.mxu0 %v2053_v0  ;;  %v2060_v5 = vld [vmem:[#allocation6 + $0x70] sm:$0xff]  ;;  %v2059_v9 = vld [vmem:[#allocation6 + $0x68] sm:$0xff]  ;;  %s2513_s23 = sld [smem:[#allocation11 + $0x1]]  ;;  %s1504_s30 = sshll.u32 %s2345_s29, 4  ;;  %s1505_s30 = int_to_ptr.vmem [resolvable:$true] %s1504_s30 }
  0x1d   :  { %v2069_v2 = vld [vmem:[#allocation6 + $0xb8] sm:$0xff]  ;;  %637 = vmatpush.bf16.msra.mxu1 %v2061_v1  ;;  %v2068_v6 = vld [vmem:[#allocation6 + $0xb0] sm:$0xff]  ;;  %v2067_v10 = vld [vmem:[#allocation6 + $0xa8] sm:$0xff]  ;;  %s2517_s24 = sld [smem:[#allocation11 + $0x81]]  ;;  %s1506_s9 = sshll.u32 %s2549_s6, 4  ;;  %s1507_s9 = int_to_ptr.hbm [resolvable:$true] %s1506_s9 }
  0x1e   :  { %v2077_v3 = vld [vmem:[#allocation6 + $0xf8] sm:$0xff]  ;;  %650 = vmatpush.bf16.msra.mxu2 %v2069_v2  ;;  %v2076_v7 = vld [vmem:[#allocation6 + $0xf0] sm:$0xff]  ;;  %v2075_v11 = vld [vmem:[#allocation6 + $0xe8] sm:$0xff]  ;;  %s2524_s25 = sld [smem:[#allocation11 + $0x2]] }
  0x1f   :  { %663 = vmatpush.bf16.msra.mxu3 %v2077_v3  ;;  %v2050_v12 = vld [vmem:[#allocation6 + $0x20] sm:$0xff]  ;;  %v2049_v16 = vld [vmem:[#allocation6 + $0x18] sm:$0xff]  ;;  %v2048_v20 = vld [vmem:[#allocation6 + $0x10] sm:$0xff]  ;;  %s2039_s26 = sld [smem:[#allocation11 + $0x82]] }
  0x20   :  { %625 = vmatpush.bf16.msra.mxu0 %v2052_v4  ;;  %v2058_v13 = vld [vmem:[#allocation6 + $0x60] sm:$0xff]  ;;  %v2057_v17 = vld [vmem:[#allocation6 + $0x58] sm:$0xff]  ;;  %v2056_v21 = vld [vmem:[#allocation6 + $0x50] sm:$0xff]  ;;  %s2042_s27 = sld [smem:[#allocation11 + $0x3]] }
  0x21   :  { %638 = vmatpush.bf16.msra.mxu1 %v2060_v5  ;;  %v2066_v14 = vld [vmem:[#allocation6 + $0xa0] sm:$0xff]  ;;  %v2065_v18 = vld [vmem:[#allocation6 + $0x98] sm:$0xff]  ;;  %v2064_v22 = vld [vmem:[#allocation6 + $0x90] sm:$0xff]  ;;  %s2043_s28 = sld [smem:[#allocation11 + $0x83]] }
  0x22   :  { %651 = vmatpush.bf16.msra.mxu2 %v2068_v6  ;;  %v2074_v15 = vld [vmem:[#allocation6 + $0xe0] sm:$0xff]  ;;  %v2073_v19 = vld [vmem:[#allocation6 + $0xd8] sm:$0xff]  ;;  %v2072_v23 = vld [vmem:[#allocation6 + $0xd0] sm:$0xff] }
  0x23   :  { %664 = vmatpush.bf16.msra.mxu3 %v2076_v7  ;;  %v2047_v24 = vld [vmem:[#allocation6 + $0x8] sm:$0xff]  ;;  %v2046_v28 = vld [vmem:[#allocation6] sm:$0xff]  ;;  %v2085_v32 = vld [vmem:[#allocation6 + $0x138] sm:$0xff] }
  0x24   :  { %626 = vmatpush.bf16.msra.mxu0 %v2051_v8  ;;  %v2055_v25 = vld [vmem:[#allocation6 + $0x48] sm:$0xff]  ;;  %v2054_v29 = vld [vmem:[#allocation6 + $0x40] sm:$0xff]  ;;  %v2396_v33 = vld [vmem:[#allocation2 + $0x10] sm:$0xff] }
  0x25   :  { %639 = vmatpush.bf16.msra.mxu1 %v2059_v9  ;;  %v2063_v26 = vld [vmem:[#allocation6 + $0x88] sm:$0xff]  ;;  %v2062_v30 = vld [vmem:[#allocation6 + $0x80] sm:$0xff]  ;;  %v2093_v35 = vld [vmem:[#allocation6 + $0x178] sm:$0xff]  ;;  %v106_v40 = vpack.c.bf16 %v2396_v33, %v2396_v33 }
  0x26   :  { %652 = vmatpush.bf16.msra.mxu2 %v2067_v10  ;;  %v2071_v27 = vld [vmem:[#allocation6 + $0xc8] sm:$0xff]  ;;  %v2070_v31 = vld [vmem:[#allocation6 + $0xc0] sm:$0xff]  ;;  %v2400_v36 = vld [vmem:[#allocation2 + $0x18] sm:$0xff] }
  0x27   :  { %665 = vmatpush.bf16.msra.mxu3 %v2075_v11  ;;  %v2398_v34 = vld [vmem:[#allocation2] sm:$0xff]  ;;  %v2402_v37 = vld [vmem:[#allocation2 + $0x8] sm:$0xff]  ;;  %v2101_v38 = vld [vmem:[#allocation6 + $0x1b8] sm:$0xff]  ;;  %v107_v42 = vpack.c.bf16 %v2400_v36, %v2400_v36 }
  0x28   :  { %627 = vmatpush.bf16.msra.mxu0 %v2050_v12  ;;  %v2109_v39 = vld [vmem:[#allocation6 + $0x1f8] sm:$0xff]  ;;  %v104_v41 = vpack.c.bf16 %v2398_v34, %v2398_v34  ;;  %v105_v43 = vpack.c.bf16 %v2402_v37, %v2402_v37  ;;  %v2084_v44 = vld [vmem:[#allocation6 + $0x130] sm:$0xff]  ;;  %v2083_v48 = vld [vmem:[#allocation6 + $0x128] sm:$0xff] }
  0x29   :  { %640 = vmatpush.bf16.msra.mxu1 %v2058_v13  ;;  %v2092_v45 = vld [vmem:[#allocation6 + $0x170] sm:$0xff]  ;;  %v2091_v49 = vld [vmem:[#allocation6 + $0x168] sm:$0xff]  ;;  %v2082_v52 = vld [vmem:[#allocation6 + $0x120] sm:$0xff] }
  0x2a   :  { %653 = vmatpush.bf16.msra.mxu2 %v2066_v14  ;;  %v2100_v46 = vld [vmem:[#allocation6 + $0x1b0] sm:$0xff]  ;;  %v2099_v50 = vld [vmem:[#allocation6 + $0x1a8] sm:$0xff]  ;;  %v2090_v53 = vld [vmem:[#allocation6 + $0x160] sm:$0xff] }
  0x2b   :  { %666 = vmatpush.bf16.msra.mxu3 %v2074_v15  ;;  %v2108_v47 = vld [vmem:[#allocation6 + $0x1f0] sm:$0xff]  ;;  %v2107_v51 = vld [vmem:[#allocation6 + $0x1e8] sm:$0xff]  ;;  %v2098_v54 = vld [vmem:[#allocation6 + $0x1a0] sm:$0xff] }
  0x2c   :  { %628 = vmatpush.bf16.msra.mxu0 %v2049_v16  ;;  %v2106_v55 = vld [vmem:[#allocation6 + $0x1e0] sm:$0xff]  ;;  %v2081_v56 = vld [vmem:[#allocation6 + $0x118] sm:$0xff]  ;;  %v2080_v60 = vld [vmem:[#allocation6 + $0x110] sm:$0xff] }
  0x2d   :  { %641 = vmatpush.bf16.msra.mxu1 %v2057_v17  ;;  %v2089_v57 = vld [vmem:[#allocation6 + $0x158] sm:$0xff]  ;;  %v2088_v61 = vld [vmem:[#allocation6 + $0x150] sm:$0xff]  ;;  %v2079_v0 = vld [vmem:[#allocation6 + $0x108] sm:$0xff] }
  0x2e   :  { %654 = vmatpush.bf16.msra.mxu2 %v2065_v18  ;;  %v2097_v58 = vld [vmem:[#allocation6 + $0x198] sm:$0xff]  ;;  %v2096_v62 = vld [vmem:[#allocation6 + $0x190] sm:$0xff]  ;;  %v2087_v1 = vld [vmem:[#allocation6 + $0x148] sm:$0xff] }
  0x2f   :  { %667 = vmatpush.bf16.msra.mxu3 %v2073_v19  ;;  %v2105_v59 = vld [vmem:[#allocation6 + $0x1d8] sm:$0xff]  ;;  %v2104_v63 = vld [vmem:[#allocation6 + $0x1d0] sm:$0xff]  ;;  %v2095_v2 = vld [vmem:[#allocation6 + $0x188] sm:$0xff] }
  0x30   :  { %629 = vmatpush.bf16.msra.mxu0 %v2048_v20  ;;  %v2103_v3 = vld [vmem:[#allocation6 + $0x1c8] sm:$0xff]  ;;  %v2078_v4 = vld [vmem:[#allocation6 + $0x100] sm:$0xff]  ;;  %v2416_v10 = vld [vmem:[#allocation2 + $0x30] sm:$0xff] }
  0x31   :  { %642 = vmatpush.bf16.msra.mxu1 %v2056_v21  ;;  %v2086_v5 = vld [vmem:[#allocation6 + $0x140] sm:$0xff]  ;;  %v2414_v8 = vld [vmem:[#allocation2 + $0x28] sm:$0xff]  ;;  %v2418_v11 = vld [vmem:[#allocation2 + $0x38] sm:$0xff]  ;;  %v110_v14 = vpack.c.bf16 %v2416_v10, %v2416_v10 }
  0x32   :  { %655 = vmatpush.bf16.msra.mxu2 %v2064_v22  ;;  %v2094_v6 = vld [vmem:[#allocation6 + $0x180] sm:$0xff]  ;;  %v109_v13 = vpack.c.bf16 %v2414_v8, %v2414_v8  ;;  %v111_v15 = vpack.c.bf16 %v2418_v11, %v2418_v11 }
  0x33   :  { %668 = vmatpush.bf16.msra.mxu3 %v2072_v23  ;;  %v2412_v7 = vld [vmem:[#allocation2 + $0x20] sm:$0xff] }
  0x34   :  { %630 = vmatpush.bf16.msra.mxu0 %v2047_v24  ;;  %v2102_v9 = vld [vmem:[#allocation6 + $0x1c0] sm:$0xff]  ;;  %v108_v12 = vpack.c.bf16 %v2412_v7, %v2412_v7 }
  0x35   :  { %643 = vmatpush.bf16.msra.mxu1 %v2055_v25  ;;  %v2001_v24 = vld [vmem:[#allocation8 + $0x1c0] sm:$0xf] }
  0x36   :  { %656 = vmatpush.bf16.msra.mxu2 %v2063_v26  ;;  %v2170_v25 = vld [vmem:[#allocation8 + $0x1dc] sm:$0xf0]  ;;  %v2166_v26 = vld [vmem:[#allocation8 + $0x1c4] sm:$0xf] }
  0x37   :  { %669 = vmatpush.bf16.msra.mxu3 %v2071_v27  ;;  %v2002_v27 = vor.u32 %v2170_v25, %v2001_v24  ;;  %v2138_v24 = vld [vmem:[#allocation8 + $0xdc] sm:$0xf0]  ;;  %v2134_v25 = vld [vmem:[#allocation8 + $0xc4] sm:$0xf] }
  0x38   :  { %631 = vmatpush.bf16.msra.mxu0 %v2046_v28  ;;  %v2003_v28 = vld [vmem:[#allocation8 + $0x1e0] sm:$0xf0] }
  0x39   :  { %644 = vmatpush.bf16.msra.mxu1 %v2054_v29  ;;  %v2009_v29 = vld [vmem:[#allocation8 + $0x1c8] sm:$0xf] }
  0x3a   :  { %657 = vmatpush.bf16.msra.mxu2 %v2062_v30  ;;  %v2171_v30 = vld [vmem:[#allocation8 + $0x1e4] sm:$0xf0] }
  0x3b   :  { %670 = vmatpush.bf16.msra.mxu3 %v2070_v31  ;;  %632 = vmatmul.bf16.vlgmr.msra.gmra.mxu0 %v104_v41  ;;  %v2006_v31 = vor.u32 %v2166_v26, %v2003_v28  ;;  %v2162_v41 = vld [vmem:[#allocation8 + $0x19c] sm:$0xf0]  ;;  %v1875_v26 = vld [vmem:[#allocation8 + $0xe0] sm:$0xf0]  ;;  %v2139_v28 = vld [vmem:[#allocation8 + $0xe4] sm:$0xf0] }
  0x3c   :  { %676 = vmatpush.bf16.msrb.mxu0 %v2085_v32  ;;  %645 = vmatmul.bf16.vlgmr.msra.gmra.mxu1 %v105_v43  ;;  %v2010_v32 = vor.u32 %v2171_v30, %v2009_v29  ;;  %v1878_v29 = vor.u32 %v2134_v25, %v1875_v26  ;;  %v2115_v25 = vld [vmem:[#allocation8 + $0x24] sm:$0xf0]  ;;  %v1787_v26 = vld [vmem:[#allocation8 + $0x28] sm:$0xf0] }
  0x3d   :  { %689 = vmatpush.bf16.msrb.mxu1 %v2093_v35  ;;  %658 = vmatmul.bf16.vlgmr.msra.gmra.mxu2 %v106_v40  ;;  %v2167_v35 = vld [vmem:[#allocation8 + $0x1cc] sm:$0xf]  ;;  %v1969_v40 = vld [vmem:[#allocation8 + $0x180] sm:$0xf] }
  0x3e   :  { %702 = vmatpush.bf16.msrb.mxu2 %v2101_v38  ;;  %671 = vmatmul.bf16.vlgmr.msra.gmra.mxu3 %v107_v42  ;;  %v2011_v38 = vld [vmem:[#allocation8 + $0x1e8] sm:$0xf0]  ;;  %v2158_v42 = vld [vmem:[#allocation8 + $0x184] sm:$0xf] }
  0x3f   :  { %715 = vmatpush.bf16.msrb.mxu3 %v2109_v39  ;;  %v2014_v39 = vor.u32 %v2167_v35, %v2011_v38 }
  0x40   :  { %677 = vmatpush.bf16.msrb.mxu0 %v2084_v44  ;;  %v1970_v44 = vor.u32 %v2162_v41, %v1969_v40  ;;  %v1841_v41 = vld [vmem:[#allocation8 + $0x80] sm:$0xf] }
  0x41   :  { %690 = vmatpush.bf16.msrb.mxu1 %v2092_v45  ;;  %v1971_v45 = vld [vmem:[#allocation8 + $0x1a0] sm:$0xf0] }
  0x42   :  { %703 = vmatpush.bf16.msrb.mxu2 %v2100_v46  ;;  %v1977_v46 = vld [vmem:[#allocation8 + $0x188] sm:$0xf] }
  0x43   :  { %716 = vmatpush.bf16.msrb.mxu3 %v2108_v47  ;;  %v2163_v47 = vld [vmem:[#allocation8 + $0x1a4] sm:$0xf0] }
  0x44   :  { %678 = vmatpush.bf16.msrb.mxu0 %v2083_v48  ;;  %v1974_v48 = vor.u32 %v2158_v42, %v1971_v45  ;;  %v2130_v42 = vld [vmem:[#allocation8 + $0x9c] sm:$0xf0] }
  0x45   :  { %691 = vmatpush.bf16.msrb.mxu1 %v2091_v49  ;;  %v1978_v49 = vor.u32 %v2163_v47, %v1977_v46  ;;  %v1842_v47 = vor.u32 %v2130_v42, %v1841_v41 }
  0x46   :  { %704 = vmatpush.bf16.msrb.mxu2 %v2099_v50  ;;  %v2159_v50 = vld [vmem:[#allocation8 + $0x18c] sm:$0xf] }
  0x47   :  { %717 = vmatpush.bf16.msrb.mxu3 %v2107_v51  ;;  %v1979_v51 = vld [vmem:[#allocation8 + $0x1a8] sm:$0xf0] }
  0x48   :  { %679 = vmatpush.bf16.msrb.mxu0 %v2082_v52  ;;  %v1982_v52 = vor.u32 %v2159_v50, %v1979_v51  ;;  %v2131_v50 = vld [vmem:[#allocation8 + $0xa4] sm:$0xf0] }
  0x49   :  { %692 = vmatpush.bf16.msrb.mxu1 %v2090_v53  ;;  %v1937_v53 = vld [vmem:[#allocation8 + $0x140] sm:$0xf] }
  0x4a   :  { %705 = vmatpush.bf16.msrb.mxu2 %v2098_v54  ;;  %v2154_v54 = vld [vmem:[#allocation8 + $0x15c] sm:$0xf0] }
  0x4b   :  { %718 = vmatpush.bf16.msrb.mxu3 %v2106_v55  ;;  %v2150_v55 = vld [vmem:[#allocation8 + $0x144] sm:$0xf] }
  0x4c   :  { %680 = vmatpush.bf16.msrb.mxu0 %v2081_v56 }
  0x4d   :  { %693 = vmatpush.bf16.msrb.mxu1 %v2089_v57  ;;  %v1938_v57 = vor.u32 %v2154_v54, %v1937_v53  ;;  %v2127_v53 = vld [vmem:[#allocation8 + $0x8c] sm:$0xf] }
  0x4e   :  { %706 = vmatpush.bf16.msrb.mxu2 %v2097_v58  ;;  %v1939_v58 = vld [vmem:[#allocation8 + $0x160] sm:$0xf0]  ;;  %v1851_v54 = vld [vmem:[#allocation8 + $0xa8] sm:$0xf0] }
  0x4f   :  { %719 = vmatpush.bf16.msrb.mxu3 %v2105_v59  ;;  %v1945_v59 = vld [vmem:[#allocation8 + $0x148] sm:$0xf] }
  0x50   :  { %681 = vmatpush.bf16.msrb.mxu0 %v2080_v60  ;;  %v2155_v60 = vld [vmem:[#allocation8 + $0x164] sm:$0xf0] }
  0x51   :  { %694 = vmatpush.bf16.msrb.mxu1 %v2088_v61  ;;  %v1942_v61 = vor.u32 %v2150_v55, %v1939_v58  ;;  %v2122_v58 = vld [vmem:[#allocation8 + $0x5c] sm:$0xf0] }
  0x52   :  { %707 = vmatpush.bf16.msrb.mxu2 %v2096_v62  ;;  %v1946_v62 = vor.u32 %v2155_v60, %v1945_v59  ;;  %v2118_v59 = vld [vmem:[#allocation8 + $0x44] sm:$0xf] }
  0x53   :  { %720 = vmatpush.bf16.msrb.mxu3 %v2104_v63  ;;  %v2151_v63 = vld [vmem:[#allocation8 + $0x14c] sm:$0xf] }
  0x54   :  { %682 = vmatpush.bf16.msrb.mxu0 %v2079_v0  ;;  %v1947_v0 = vld [vmem:[#allocation8 + $0x168] sm:$0xf0] }
  0x55   :  { %695 = vmatpush.bf16.msrb.mxu1 %v2087_v1  ;;  %v1950_v1 = vor.u32 %v2151_v63, %v1947_v0  ;;  %v1811_v63 = vld [vmem:[#allocation8 + $0x60] sm:$0xf0]  ;;  %v1817_v0 = vld [vmem:[#allocation8 + $0x48] sm:$0xf] }
  0x56   :  { %708 = vmatpush.bf16.msrb.mxu2 %v2095_v2  ;;  %v1905_v2 = vld [vmem:[#allocation8 + $0x100] sm:$0xf] }
  0x57   :  { %721 = vmatpush.bf16.msrb.mxu3 %v2103_v3  ;;  %v2146_v3 = vld [vmem:[#allocation8 + $0x11c] sm:$0xf0] }
  0x58   :  { %683 = vmatpush.bf16.msrb.mxu0 %v2078_v4  ;;  %v2142_v4 = vld [vmem:[#allocation8 + $0x104] sm:$0xf] }
  0x59   :  { %696 = vmatpush.bf16.msrb.mxu1 %v2086_v5 }
  0x5a   :  { %709 = vmatpush.bf16.msrb.mxu2 %v2094_v6 }
  0x5b   :  { %722 = vmatpush.bf16.msrb.mxu3 %v2102_v9  ;;  %684 = vmatmul.bf16.vlgmr.msrb.gmra.mxu0 %v108_v12  ;;  %v1906_v12 = vor.u32 %v2146_v3, %v1905_v2  ;;  %v2123_v2 = vld [vmem:[#allocation8 + $0x64] sm:$0xf0]  ;;  %v2119_v3 = vld [vmem:[#allocation8 + $0x4c] sm:$0xf] }
  0x5c   :  { %697 = vmatmul.bf16.vlgmr.msrb.gmra.mxu1 %v109_v13  ;;  %1153 = vmatpush.bf16.msra.mxu0 %v2002_v27  ;;  %v1907_v13 = vld [vmem:[#allocation8 + $0x120] sm:$0xf0]  ;;  %v1881_v27 = vld [vmem:[#allocation8 + $0xc8] sm:$0xf] }
  0x5d   :  { %710 = vmatmul.bf16.vlgmr.msrb.gmra.mxu2 %v110_v14  ;;  %1166 = vmatpush.bf16.msra.mxu1 %v2006_v31  ;;  %v1913_v14 = vld [vmem:[#allocation8 + $0x108] sm:$0xf]  ;;  %v1882_v30 = vor.u32 %v2139_v28, %v1881_v27  ;;  %v2135_v31 = vld [vmem:[#allocation8 + $0xcc] sm:$0xf] }
  0x5e   :  { %723 = vmatmul.bf16.vlgmr.msrb.gmra.mxu3 %v111_v15  ;;  %1179 = vmatpush.bf16.msra.mxu2 %v2010_v32  ;;  %v2147_v15 = vld [vmem:[#allocation8 + $0x124] sm:$0xf0]  ;;  %v1883_v32 = vld [vmem:[#allocation8 + $0xe8] sm:$0xf0] }
  0x5f   :  { %1192 = vmatpush.bf16.msra.mxu3 %v2014_v39  ;;  %v1886_v38 = vor.u32 %v2135_v31, %v1883_v32  ;;  %v2017_v31 = vld [vmem:[#allocation8 + $0x1d0] sm:$0xf] }
  0x60   :  { %1154 = vmatpush.bf16.msra.mxu0 %v1970_v44  ;;  %v2172_v32 = vld [vmem:[#allocation8 + $0x1ec] sm:$0xf0] }
  0x61   :  { %1167 = vmatpush.bf16.msra.mxu1 %v1974_v48  ;;  %v1843_v48 = vld [vmem:[#allocation8 + $0xa0] sm:$0xf0] }
  0x62   :  { %1180 = vmatpush.bf16.msra.mxu2 %v1978_v49  ;;  %v1849_v49 = vld [vmem:[#allocation8 + $0x88] sm:$0xf] }
  0x63   :  { %1193 = vmatpush.bf16.msra.mxu3 %v1982_v52  ;;  %v1850_v52 = vor.u32 %v2131_v50, %v1849_v49  ;;  %v2164_v49 = vld [vmem:[#allocation8 + $0x1ac] sm:$0xf0] }
  0x64   :  { %1155 = vmatpush.bf16.msra.mxu0 %v1938_v57  ;;  %v1809_v57 = vld [vmem:[#allocation8 + $0x40] sm:$0xf] }
  0x65   :  { %1168 = vmatpush.bf16.msra.mxu1 %v1942_v61 }
  0x66   :  { %1181 = vmatpush.bf16.msra.mxu2 %v1946_v62  ;;  %v1810_v62 = vor.u32 %v2122_v58, %v1809_v57  ;;  %v1993_v58 = vld [vmem:[#allocation8 + $0x198] sm:$0xf] }
  0x67   :  { %1194 = vmatpush.bf16.msra.mxu3 %v1950_v1  ;;  %v1814_v1 = vor.u32 %v2118_v59, %v1811_v63  ;;  %v2165_v59 = vld [vmem:[#allocation8 + $0x1b4] sm:$0xf0] }
  0x68   :  { %1156 = vmatpush.bf16.msra.mxu0 %v1906_v12  ;;  %v1994_v63 = vor.u32 %v2165_v59, %v1993_v58  ;;  %v2129_v58 = vld [vmem:[#allocation8 + $0x9c] sm:$0xf] }
  0xb8   :  { %v633_v16 = vpop.f32.mrf.mxu0 }
  0xb9   :  { %v646_v17 = vpop.f32.mrf.mxu1 }
  0xba   :  { %v647_v43 = vadd.f32 %v646_v17, %v633_v16  ;;  %v1910_v16 = vor.u32 %v2142_v4, %v1907_v13  ;;  %v1914_v17 = vor.u32 %v2147_v15, %v1913_v14  ;;  %v1819_v4 = vld [vmem:[#allocation8 + $0x68] sm:$0xf0]  ;;  %v1777_v15 = vld [vmem:[#allocation8] sm:$0xf] }
  0xbb   :  { %v1822_v12 = vor.u32 %v2119_v3, %v1819_v4  ;;  %v2156_v3 = vld [vmem:[#allocation8 + $0x16c] sm:$0xf0]  ;;  %v2152_v4 = vld [vmem:[#allocation8 + $0x154] sm:$0xf] }
  0xbc   :  { %1169 = vmatpush.bf16.msra.mxu1 %v1910_v16  ;;  %1182 = vmatpush.bf16.msra.mxu2 %v1914_v17  ;;  %v2114_v16 = vld [vmem:[#allocation8 + $0x1c] sm:$0xf0]  ;;  %v2110_v17 = vld [vmem:[#allocation8 + $0x4] sm:$0xf] }
  0xc0   :  { %v659_v18 = vpop.f32.mrf.mxu2  ;;  %v635_v20 = vpop.f32.mrf.mxu0  ;;  %1170 = vmatpush.bf16.msra.mxu1 %v1878_v29  ;;  %1183 = vmatpush.bf16.msra.mxu2 %v1882_v30 }
  0xc1   :  { %v672_v19 = vpop.f32.mrf.mxu3  ;;  %v648_v21 = vpop.f32.mrf.mxu1  ;;  %v660_v56 = vadd.f32 %v659_v18, %v647_v43  ;;  %v2143_v18 = vld [vmem:[#allocation8 + $0x10c] sm:$0xf]  ;;  %v2126_v43 = vld [vmem:[#allocation8 + $0x84] sm:$0xf] }
  0xc2   :  { %v1915_v20 = vld [vmem:[#allocation8 + $0x128] sm:$0xf0]  ;;  %v1846_v51 = vor.u32 %v2126_v43, %v1843_v48  ;;  %v1985_v48 = vld [vmem:[#allocation8 + $0x190] sm:$0xf] }
  0xc3   :  { %v673_v5 = vadd.f32 %v672_v19, %v660_v56  ;;  %v1854_v56 = vor.u32 %v2127_v53, %v1851_v54  ;;  %v1986_v53 = vor.u32 %v2164_v49, %v1985_v48  ;;  %v2160_v54 = vld [vmem:[#allocation8 + $0x194] sm:$0xf]  ;;  %v1899_v48 = vld [vmem:[#allocation8 + $0xf8] sm:$0xf0]  ;;  %v1857_v49 = vld [vmem:[#allocation8 + $0x90] sm:$0xf] }
  0xc4   :  { %1171 = vmatpush.bf16.msra.mxu1 %v1846_v51  ;;  %1184 = vmatpush.bf16.msra.mxu2 %v1850_v52 }
  0xc8   :  { %v661_v22 = vpop.f32.mrf.mxu2  ;;  %1172 = vmatpush.bf16.msra.mxu1 %v1814_v1  ;;  %v1953_v1 = vld [vmem:[#allocation8 + $0x150] sm:$0xf] }
  0xc9   :  { %v674_v23 = vpop.f32.mrf.mxu3  ;;  %v1918_v22 = vor.u32 %v2143_v18, %v1915_v20 }
  0xca   :  { %v1873_v23 = vld [vmem:[#allocation8 + $0xc0] sm:$0xf] }
  0xcb   :  { %1195 = vmatpush.bf16.msra.mxu3 %v1918_v22  ;;  %v1874_v19 = vor.u32 %v2138_v24, %v1873_v23  ;;  %v1779_v22 = vld [vmem:[#allocation8 + $0x20] sm:$0xf0]  ;;  %v1785_v23 = vld [vmem:[#allocation8 + $0x8] sm:$0xf] }
  0xcc   :  { %v1782_v24 = vor.u32 %v2110_v17, %v1779_v22  ;;  %v1786_v29 = vor.u32 %v2115_v25, %v1785_v23  ;;  %v2153_v17 = vld [vmem:[#allocation8 + $0x15c] sm:$0xf]  ;;  %v1921_v22 = vld [vmem:[#allocation8 + $0x110] sm:$0xf] }
  0xcd   :  { %1157 = vmatpush.bf16.msra.mxu0 %v1874_v19  ;;  %v2111_v19 = vld [vmem:[#allocation8 + $0xc] sm:$0xf]  ;;  %v2148_v23 = vld [vmem:[#allocation8 + $0x12c] sm:$0xf0] }
  0xce   :  { %v1790_v30 = vor.u32 %v2111_v19, %v1787_v26  ;;  %1173 = vmatpush.bf16.msra.mxu1 %v1782_v24  ;;  %v2144_v24 = vld [vmem:[#allocation8 + $0x114] sm:$0xf]  ;;  %v1922_v25 = vor.u32 %v2148_v23, %v1921_v22  ;;  %v1929_v26 = vld [vmem:[#allocation8 + $0x118] sm:$0xf] }
  0xcf   :  { %1196 = vmatpush.bf16.msra.mxu3 %v1886_v38  ;;  %v2168_v38 = vld [vmem:[#allocation8 + $0x1d4] sm:$0xf] }
  0xd0   :  { %v1923_v19 = vld [vmem:[#allocation8 + $0x130] sm:$0xf0] }
  0xd1   :  { %1158 = vmatpush.bf16.msra.mxu0 %v1842_v47  ;;  %v2027_v47 = vld [vmem:[#allocation8 + $0x1f8] sm:$0xf0]  ;;  %v2112_v22 = vld [vmem:[#allocation8 + $0x14] sm:$0xf] }
  0xd2   :  { %v1795_v23 = vld [vmem:[#allocation8 + $0x30] sm:$0xf0] }
  0xd3   :  { %1197 = vmatpush.bf16.msra.mxu3 %v1854_v56  ;;  %v1987_v56 = vld [vmem:[#allocation8 + $0x1b0] sm:$0xf0] }
  0xd4   :  { %v1990_v57 = vor.u32 %v2160_v54, %v1987_v56  ;;  %v1865_v56 = vld [vmem:[#allocation8 + $0x98] sm:$0xf] }
  0xd5   :  { %1159 = vmatpush.bf16.msra.mxu0 %v1810_v62 }
  0xd7   :  { %1198 = vmatpush.bf16.msra.mxu3 %v1822_v12  ;;  %v1954_v12 = vor.u32 %v2156_v3, %v1953_v1  ;;  %v2120_v3 = vld [vmem:[#allocation8 + $0x54] sm:$0xf] }
  0xd8   :  { %v685_v6 = vpop.f32.mrf.mxu0 }
  0xd9   :  { %v698_v9 = vpop.f32.mrf.mxu1  ;;  %v686_v21 = vadd.f32 %v685_v6, %v673_v5 }
  0xdb   :  { %v699_v35 = vadd.f32 %v698_v9, %v686_v21  ;;  %v1818_v9 = vor.u32 %v2123_v2, %v1817_v0  ;;  %v1778_v21 = vor.u32 %v2114_v16, %v1777_v15  ;;  %1199 = vmatpush.bf16.msra.mxu3 %v1790_v30  ;;  %v1995_v0 = vld [vmem:[#allocation8 + $0x1b8] sm:$0xf0]  ;;  %v2157_v15 = vld [vmem:[#allocation8 + $0x174] sm:$0xf0] }
  0xdc   :  { %v2145_v30 = vld [vmem:[#allocation8 + $0x11c] sm:$0xf] }
  0xdd   :  { %1185 = vmatpush.bf16.msra.mxu2 %v1818_v9  ;;  %1160 = vmatpush.bf16.msra.mxu0 %v1778_v21 }
  0xe0   :  { %v711_v39 = vpop.f32.mrf.mxu2  ;;  %v687_v45 = vpop.f32.mrf.mxu0 }
  0xe1   :  { %v724_v40 = vpop.f32.mrf.mxu3  ;;  %v712_v44 = vadd.f32 %v711_v39, %v699_v35  ;;  %v700_v46 = vpop.f32.mrf.mxu1  ;;  %v2018_v35 = vor.u32 %v2172_v32, %v2017_v31  ;;  %v2019_v39 = vld [vmem:[#allocation8 + $0x1f0] sm:$0xf0]  ;;  %1186 = vmatpush.bf16.msra.mxu2 %v1786_v29  ;;  %v2169_v45 = vld [vmem:[#allocation8 + $0x1dc] sm:$0xf]  ;;  %v1926_v29 = vor.u32 %v2144_v24, %v1923_v19  ;;  %v2117_v19 = vld [vmem:[#allocation8 + $0x34] sm:$0xf0] }
  0xe2   :  { %v2022_v43 = vor.u32 %v2168_v38, %v2019_v39  ;;  %v2030_v52 = vor.u32 %v2169_v45, %v2027_v47  ;;  %v1931_v31 = vld [vmem:[#allocation8 + $0x138] sm:$0xf0]  ;;  %v1889_v38 = vld [vmem:[#allocation8 + $0xd0] sm:$0xf] }
  0xe3   :  { %v2428_v55 = vadd.f32 %v724_v40, %v712_v44  ;;  %v2025_v40 = vld [vmem:[#allocation8 + $0x1d8] sm:$0xf]  ;;  %1205 = vmatpush.bf16.msrb.mxu0 %v2018_v35  ;;  %v1934_v35 = vor.u32 %v2145_v30, %v1931_v31  ;;  %v2140_v39 = vld [vmem:[#allocation8 + $0xec] sm:$0xf0]  ;;  %v2137_v47 = vld [vmem:[#allocation8 + $0xdc] sm:$0xf]  ;;  %v1798_v31 = vor.u32 %v2112_v22, %v1795_v23 }
  0xe4   :  { %v2173_v44 = vld [vmem:[#allocation8 + $0x1f4] sm:$0xf0]  ;;  %1218 = vmatpush.bf16.msrb.mxu1 %v2022_v43  ;;  %1244 = vmatpush.bf16.msrb.mxu3 %v2030_v52  ;;  %v2128_v52 = vld [vmem:[#allocation8 + $0x94] sm:$0xf]  ;;  %v1803_v30 = vld [vmem:[#allocation8 + $0x38] sm:$0xf0] }
  0xe5   :  { %v728_v60 = vrot.slane %v2428_v55, 4  ;;  %v735_v61 = vmul.f32 %v2428_v55, %v2428_v55  ;;  %v2026_v46 = vor.u32 %v2173_v44, %v2025_v40  ;;  %v2136_v40 = vld [vmem:[#allocation8 + $0xd4] sm:$0xf]  ;;  %v1897_v43 = vld [vmem:[#allocation8 + $0xd8] sm:$0xf] }
  0xe6   :  { %v2141_v44 = vld [vmem:[#allocation8 + $0xf4] sm:$0xf0] }
  0xe7   :  { %v729_v5 = vadd.f32 %v728_v60, %v2428_v55  ;;  %v736_v6 = vrot.slane %v735_v61, 4  ;;  %1231 = vmatpush.bf16.msrb.mxu2 %v2026_v46  ;;  %v2161_v60 = vld [vmem:[#allocation8 + $0x19c] sm:$0xf]  ;;  %1206 = vmatpush.bf16.msrb.mxu0 %v1986_v53  ;;  %v1898_v46 = vor.u32 %v2141_v44, %v1897_v43  ;;  %v1859_v53 = vld [vmem:[#allocation8 + $0xb0] sm:$0xf0] }
  0xe8   :  { %v713_v13 = vpop.f32.mrf.mxu2  ;;  %v1998_v2 = vor.u32 %v2161_v60, %v1995_v0  ;;  %1219 = vmatpush.bf16.msrb.mxu1 %v1990_v57  ;;  %v2133_v57 = vld [vmem:[#allocation8 + $0xb4] sm:$0xf0]  ;;  %v1862_v60 = vor.u32 %v2128_v52, %v1859_v53  ;;  %v2124_v0 = vld [vmem:[#allocation8 + $0x6c] sm:$0xf0] }
  0xe9   :  { %v726_v14 = vpop.f32.mrf.mxu3  ;;  %v730_v18 = vrot.slane %v729_v5, 2  ;;  %v737_v20 = vadd.f32 %v736_v6, %v735_v61 }
  0xea   :  { %v1961_v14 = vld [vmem:[#allocation8 + $0x158] sm:$0xf]  ;;  %1245 = vmatpush.bf16.msrb.mxu3 %v1998_v2  ;;  %v1866_v2 = vor.u32 %v2133_v57, %v1865_v56 }
  0xeb   :  { %v731_v27 = vadd.f32 %v730_v18, %v729_v5  ;;  %v738_v28 = vrot.slane %v737_v20, 2  ;;  %v1955_v5 = vld [vmem:[#allocation8 + $0x170] sm:$0xf0]  ;;  %1232 = vmatpush.bf16.msrb.mxu2 %v1994_v63  ;;  %v1962_v16 = vor.u32 %v2157_v15, %v1961_v14  ;;  %v1963_v18 = vld [vmem:[#allocation8 + $0x178] sm:$0xf0]  ;;  %1207 = vmatpush.bf16.msrb.mxu0 %v1954_v12 }
  0xec   :  { %v1958_v13 = vor.u32 %v2152_v4, %v1955_v5  ;;  %v1966_v21 = vor.u32 %v2153_v17, %v1963_v18  ;;  %v1825_v63 = vld [vmem:[#allocation8 + $0x50] sm:$0xf]  ;;  %v1827_v4 = vld [vmem:[#allocation8 + $0x70] sm:$0xf0]  ;;  %v2121_v14 = vld [vmem:[#allocation8 + $0x5c] sm:$0xf] }
  0xed   :  { %v732_v41 = vrot.slane %v731_v27, 1  ;;  %v739_v42 = vadd.f32 %v738_v28, %v737_v20  ;;  %v1835_v15 = vld [vmem:[#allocation8 + $0x78] sm:$0xf0]  ;;  %v1793_v17 = vld [vmem:[#allocation8 + $0x10] sm:$0xf] }
  0xee   :  { %1220 = vmatpush.bf16.msrb.mxu1 %v1958_v13  ;;  %1246 = vmatpush.bf16.msrb.mxu3 %v1966_v21  ;;  %v1826_v13 = vor.u32 %v2124_v0, %v1825_v63  ;;  %v2116_v18 = vld [vmem:[#allocation8 + $0x2c] sm:$0xf0]  ;;  %v1838_v24 = vor.u32 %v2121_v14, %v1835_v15 }
  0xef   :  { %v733_v50 = vadd.f32 %v732_v41, %v731_v27  ;;  %v740_v51 = vrot.slane %v739_v42, 1  ;;  %v2149_v27 = vld [vmem:[#allocation8 + $0x134] sm:$0xf0]  ;;  %1233 = vmatpush.bf16.msrb.mxu2 %v1962_v16  ;;  %1208 = vmatpush.bf16.msrb.mxu0 %v1922_v25  ;;  %v1890_v41 = vor.u32 %v2140_v39, %v1889_v38  ;;  %v1830_v16 = vor.u32 %v2120_v3, %v1827_v4 }
  0xf0   :  { %v1930_v32 = vor.u32 %v2149_v27, %v1929_v26  ;;  %v1801_v25 = vld [vmem:[#allocation8 + $0x18] sm:$0xf]  ;;  %v1794_v27 = vor.u32 %v2116_v18, %v1793_v17 }
  0xf1   :  { %v2434_v61 = vmul.f32 0.125, %v733_v50  ;;  %v741_v62 = vadd.f32 %v740_v51, %v739_v42  ;;  %v1891_v42 = vld [vmem:[#allocation8 + $0xf0] sm:$0xf0]  ;;  %v1902_v50 = vor.u32 %v2137_v47, %v1899_v48  ;;  %v2132_v51 = vld [vmem:[#allocation8 + $0xac] sm:$0xf0]  ;;  %v1802_v38 = vor.u32 %v2117_v19, %v1801_v25 }
  0xf2   :  { %1221 = vmatpush.bf16.msrb.mxu1 %v1926_v29  ;;  %v1894_v45 = vor.u32 %v2136_v40, %v1891_v42  ;;  %1247 = vmatpush.bf16.msrb.mxu3 %v1934_v35  ;;  %v1858_v54 = vor.u32 %v2132_v51, %v1857_v49  ;;  %v2113_v29 = vld [vmem:[#allocation8 + $0x1c] sm:$0xf] }
  0xf3   :  { %v742_v6 = vmul.f32 0.125, %v741_v62  ;;  %v744_v9 = vmul.f32 %v2434_v61, %v2434_v61  ;;  %1234 = vmatpush.bf16.msrb.mxu2 %v1930_v32  ;;  %1209 = vmatpush.bf16.msrb.mxu0 %v1890_v41  ;;  %v1867_v62 = vld [vmem:[#allocation8 + $0xb8] sm:$0xf0]  ;;  %v743_v32 = vld [vmem:[%s2547_s4] sm:$0x3]  ;;  %v1806_v39 = vor.u32 %v2113_v29, %v1803_v30  ;;  %s2504_s4 = sld [smem:[#allocation11]] }
  0xf4   :  { %v1870_v5 = vor.u32 %v2129_v58, %v1867_v62 }
  0xf5   :  { %v745_v20 = vsub.f32 %v742_v6, %v744_v9  ;;  %v1833_v6 = vld [vmem:[#allocation8 + $0x58] sm:$0xf] }
  0xf6   :  { %1222 = vmatpush.bf16.msrb.mxu1 %v1894_v45  ;;  %1248 = vmatpush.bf16.msrb.mxu3 %v1902_v50  ;;  %v2125_v9 = vld [vmem:[#allocation8 + $0x74] sm:$0xf0]  ;;  %v1265_v50 = vld [vmem:[#allocation9] sm:$0xff] }
  0xf7   :  { %v2438_v28 = vadd.f32 1e-05, %v745_v20  ;;  %1235 = vmatpush.bf16.msrb.mxu2 %v1898_v46  ;;  %1210 = vmatpush.bf16.msrb.mxu0 %v1858_v54  ;;  %v1834_v21 = vor.u32 %v2125_v9, %v1833_v6  ;;  %v1268_v51 = vperm.slane %v1265_v50, 1  ;;  %v1269_v62 = vperm.slane %v1265_v50, 2 }
  0xf8   :  { %v1270_v63 = vperm.slane %v1265_v50, 3  ;;  %v1272_v15 = vperm.slane %v1265_v50, 5 }
  0xf9   :  { %2184 = vrsqrt.f32 %v2438_v28  ;;  %vm753_vm1 = vweird.f32 %v2438_v28 }
  0xfa   :  { %1223 = vmatpush.bf16.msrb.mxu1 %v1862_v60  ;;  %1249 = vmatpush.bf16.msrb.mxu3 %v1870_v5 }
  0xfb   :  { %1236 = vmatpush.bf16.msrb.mxu2 %v1866_v2  ;;  %1211 = vmatpush.bf16.msrb.mxu0 %v1826_v13 }
  0xfe   :  { %1224 = vmatpush.bf16.msrb.mxu1 %v1830_v16  ;;  %1250 = vmatpush.bf16.msrb.mxu3 %v1838_v24 }
  0xff   :  { %v2185_v59 = vpop.eup %2184  ;;  %1237 = vmatpush.bf16.msrb.mxu2 %v1834_v21  ;;  %1212 = vmatpush.bf16.msrb.mxu0 %v1794_v27  ;;  %v1274_v27 = vperm.slane %v1265_v50, 7 }
 0x100   :  { %v748_v1 = vmul.f32 %v2185_v59, %v2438_v28  ;;  %vm754_vm0 = vweird.f32 %v2185_v59 }
 0x101   :  { %vm755_vm2 = vmor %vm753_vm1, %vm754_vm0 }
 0x102   :  { %v749_v12 = vmul.f32 %v2185_v59, %v748_v1  ;;  %1225 = vmatpush.bf16.msrb.mxu1 %v1798_v31  ;;  %1251 = vmatpush.bf16.msrb.mxu3 %v1806_v39 }
 0x103   :  { %1238 = vmatpush.bf16.msrb.mxu2 %v1802_v38 }
 0x104   :  { %v750_v20 = vmul.f32 0.5, %v749_v12 }
 0x106   :  { %v751_v26 = vsub.f32 1.5, %v750_v20 }
 0x108   :  { %v752_v35 = vmul.f32 %v2185_v59, %v751_v26  ;;  %v1273_v26 = vperm.slane %v1265_v50, 6 }
 0x10a   :  { %v756_v40 = vsel %vm755_vm2, %v2185_v59, %v752_v35 }
 0x10b   :  { %v757_v41 = vmul.f32 %v756_v40, %v743_v32 }
 0x10d   :  { %v758_v42 = vmul.f32 %v757_v41, %v2434_v61  ;;  %v763_v44 = vperm.slane %v757_v41, 0  ;;  %v1267_v61 = vperm.slane %v1265_v50, 0 }
 0x10f   :  { %v760_v43 = vrot.slane %v758_v42, 7  ;;  %v764_v46 = vmul.f32 %v763_v44, %v2428_v55 }
 0x111   :  { %v762_v45 = vsub.f32 %v743_v32, %v760_v43 }
 0x113   :  { %v765_v47 = vperm.slane %v762_v45, 1 }
 0x115   :  { %v766_v28 = vadd.f32 %v765_v47, %v764_v46 }
 0x117   :  { %v767_v48 = vmax.f32 %v766_v28, 0.0 }
 0x119   :  { %v768_v49 = vpack.c.bf16 %v767_v48, %v767_v48 }
 0x11b   :  { %1161 = vmatmul.bf16.vlgmr.msra.gmra.mxu0 %v768_v49  ;;  %1174 = vmatmul.bf16.vlgmr.msra.gmra.mxu1 %v768_v49 }
 0x11c   :  { %1187 = vmatmul.bf16.vlgmr.msra.gmra.mxu2 %v768_v49  ;;  %1200 = vmatmul.bf16.vlgmr.msra.gmra.mxu3 %v768_v49 }
 0x12b   :  { %1213 = vmatmul.bf16.vlgmr.msrb.gmra.mxu0 %v768_v49  ;;  %1226 = vmatmul.bf16.vlgmr.msrb.gmra.mxu1 %v768_v49 }
 0x12c   :  { %1239 = vmatmul.bf16.vlgmr.msrb.gmra.mxu2 %v768_v49  ;;  %1252 = vmatmul.bf16.vlgmr.msrb.gmra.mxu3 %v768_v49 }
 0x198   :  { %v1162_v52 = vpop.f32.mrf.mxu0  ;;  %v1175_v53 = vpop.f32.mrf.mxu1 }
 0x199   :  { %v1257_v54 = vadd.f32 %v1162_v52, %v2398_v34  ;;  %v1258_v55 = vadd.f32 %v1175_v53, %v2402_v37 }
 0x19b   :  { %v2450_v56 = vadd.f32 %v1267_v61, %v1257_v54  ;;  %v2452_v57 = vadd.f32 %v1268_v51, %v1258_v55 }
 0x19d   :  { %v1291_v58 = vadd.f32 %v2452_v57, %v2450_v56  ;;  %v1294_v59 = vmul.f32 %v2450_v56, %v2450_v56  ;;  %v1295_v60 = vmul.f32 %v2452_v57, %v2452_v57 }
 0x19f   :  { %v1188_v0 = vpop.f32.mrf.mxu2  ;;  %v1201_v1 = vpop.f32.mrf.mxu3  ;;  %1292 = vadd.xlane.f32.xlu0 %v1291_v58  ;;  %v1296_v34 = vadd.f32 %v1295_v60, %v1294_v59 }
 0x1a0   :  { %v1259_v37 = vadd.f32 %v1188_v0, %v2396_v33  ;;  %v1260_v2 = vadd.f32 %v1201_v1, %v2400_v36  ;;  %v1164_v3 = vpop.f32.mrf.mxu0  ;;  %v1177_v4 = vpop.f32.mrf.mxu1  ;;  %v1271_v36 = vperm.slane %v1265_v50, 4 }
 0x1a1   :  { %1297 = vadd.xlane.f32.xlu2 %v1296_v34 }
 0x1a2   :  { %v2462_v5 = vadd.f32 %v1269_v62, %v1259_v37  ;;  %v2464_v6 = vadd.f32 %v1270_v63, %v1260_v2 }
 0x1a4   :  { %v1346_v9 = vmul.f32 %v2462_v5, %v2462_v5  ;;  %v1347_v12 = vmul.f32 %v2464_v6, %v2464_v6  ;;  %v1343_v13 = vadd.f32 %v2464_v6, %v2462_v5 }
 0x1a6   :  { %v1348_v16 = vadd.f32 %v1347_v12, %v1346_v9 }
 0x1a7   :  { %v1190_v14 = vpop.f32.mrf.mxu2  ;;  %v1203_v33 = vpop.f32.mrf.mxu3  ;;  %1344 = vadd.xlane.f32.xlu0 %v1343_v13 }
 0x1a8   :  { %v1214_v17 = vpop.f32.mrf.mxu0  ;;  %v1227_v18 = vpop.f32.mrf.mxu1 }
 0x1a9   :  { %v1261_v20 = vadd.f32 %v1214_v17, %v2412_v7  ;;  %v1262_v21 = vadd.f32 %v1227_v18, %v2414_v8  ;;  %1349 = vadd.xlane.f32.xlu2 %v1348_v16 }
 0x1ab   :  { %v2474_v22 = vadd.f32 %v1271_v36, %v1261_v20  ;;  %v2476_v23 = vadd.f32 %v1272_v15, %v1262_v21 }
 0x1ad   :  { %v1395_v24 = vadd.f32 %v2476_v23, %v2474_v22  ;;  %v1398_v25 = vmul.f32 %v2474_v22, %v2474_v22  ;;  %v1399_v19 = vmul.f32 %v2476_v23, %v2476_v23 }
 0x1af   :  { %v1240_v29 = vpop.f32.mrf.mxu2  ;;  %v1253_v7 = vpop.f32.mrf.mxu3  ;;  %1396 = vadd.xlane.f32.xlu1 %v1395_v24  ;;  %v1400_v8 = vadd.f32 %v1399_v19, %v1398_v25 }
 0x1b0   :  { %v1263_v30 = vadd.f32 %v1240_v29, %v2416_v10  ;;  %v1264_v31 = vadd.f32 %v1253_v7, %v2418_v11  ;;  %v1216_v32 = vpop.f32.mrf.mxu0  ;;  %v1229_v35 = vpop.f32.mrf.mxu1 }
 0x1b1   :  { %1401 = vadd.xlane.f32.xlu0 %v1400_v8 }
 0x1b2   :  { %v2486_v38 = vadd.f32 %v1273_v26, %v1263_v30  ;;  %v2488_v39 = vadd.f32 %v1274_v27, %v1264_v31 }
 0x1b4   :  { %v1447_v40 = vadd.f32 %v2488_v39, %v2486_v38  ;;  %v1450_v43 = vmul.f32 %v2486_v38, %v2486_v38  ;;  %v1451_v10 = vmul.f32 %v2488_v39, %v2488_v39 }
 0x1b6   :  { %v1452_v11 = vadd.f32 %v1451_v10, %v1450_v43 }
 0x1b7   :  { %v1242_v41 = vpop.f32.mrf.mxu2  ;;  %v1255_v42 = vpop.f32.mrf.mxu3  ;;  %1448 = vadd.xlane.f32.xlu1 %v1447_v40 }
 0x1bf   :  { %1453 = vadd.xlane.f32.xlu1 %v1452_v11 }
 0x212   :  { %v1293_v44 = vpop.xlane.xlu0 %1292 }
 0x213   :  { %v1299_v45 = vrot.slane %v1293_v44, 4 }
 0x214   :  { %v1298_v46 = vpop.xlane.xlu2 %1297 }
 0x215   :  { %v1300_v47 = vadd.f32 %v1299_v45, %v1293_v44  ;;  %v1306_v28 = vrot.slane %v1298_v46, 4 }
 0x217   :  { %v1301_v48 = vrot.slane %v1300_v47, 2  ;;  %v1307_v49 = vadd.f32 %v1306_v28, %v1298_v46 }
 0x219   :  { %v1302_v50 = vadd.f32 %v1301_v48, %v1300_v47  ;;  %v1308_v61 = vrot.slane %v1307_v49, 2 }
 0x21a   :  { %v1345_v51 = vpop.xlane.xlu0 %1344 }
 0x21b   :  { %v1303_v52 = vrot.slane %v1302_v50, 1  ;;  %v1309_v53 = vadd.f32 %v1308_v61, %v1307_v49  ;;  %v1351_v54 = vrot.slane %v1345_v51, 4 }
 0x21c   :  { %v1350_v55 = vpop.xlane.xlu2 %1349 }
 0x21d   :  { %v1304_v58 = vadd.f32 %v1303_v52, %v1302_v50  ;;  %v1310_v59 = vrot.slane %v1309_v53, 1  ;;  %v1352_v60 = vadd.f32 %v1351_v54, %v1345_v51  ;;  %v1358_v62 = vrot.slane %v1350_v55, 4 }
 0x21f   :  { %v2496_v63 = vmul.f32 0.00048828125, %v1304_v58  ;;  %v1311_v0 = vadd.f32 %v1310_v59, %v1309_v53  ;;  %v1353_v1 = vrot.slane %v1352_v60, 2  ;;  %v1359_v34 = vadd.f32 %v1358_v62, %v1350_v55 }
 0x220   :  { %v1327_v59 = vstv %s2504_s4 }
 0x221   :  { %v1314_v37 = vmul.f32 %v2496_v63, %v2496_v63  ;;  %v1312_v2 = vmul.f32 0.00048828125, %v1311_v0  ;;  %v1354_v3 = vadd.f32 %v1353_v1, %v1352_v60  ;;  %v1360_v4 = vrot.slane %v1359_v34, 2 }
 0x222   :  { %v1397_v9 = vpop.xlane.xlu1 %1396 }
 0x223   :  { %v1315_v12 = vsub.f32 %v1312_v2, %v1314_v37  ;;  %v1355_v13 = vrot.slane %v1354_v3, 1  ;;  %v1403_v14 = vrot.slane %v1397_v9, 4  ;;  %v1361_v33 = vadd.f32 %v1360_v4, %v1359_v34 }
 0x224   :  { %v1402_v36 = vpop.xlane.xlu0 %1401 }
 0x225   :  { %v1316_v15 = vadd.f32 1e-05, %v1315_v12  ;;  %v1356_v16 = vadd.f32 %v1355_v13, %v1354_v3  ;;  %v1404_v17 = vadd.f32 %v1403_v14, %v1397_v9  ;;  %v1410_v18 = vrot.slane %v1402_v36, 4 }
 0x226   :  { %v1362_v20 = vrot.slane %v1361_v33, 1  ;;  %v1331_v9 = vstv %s2510_s22 }
 0x227   :  { %2186 = vrsqrt.f32 %v1316_v15  ;;  %v2500_v21 = vmul.f32 0.00048828125, %v1356_v16  ;;  %v1405_v24 = vrot.slane %v1404_v17, 2  ;;  %v1411_v19 = vadd.f32 %v1410_v18, %v1402_v36 }
 0x228   :  { %v1363_v25 = vadd.f32 %v1362_v20, %v1361_v33  ;;  %vm1323_vm4 = vweird.f32 %v1316_v15  ;;  %v1379_v20 = vstv %s2513_s23 }
 0x229   :  { %v1366_v26 = vmul.f32 %v2500_v21, %v2500_v21  ;;  %v1406_v27 = vadd.f32 %v1405_v24, %v1404_v17  ;;  %v1412_v7 = vrot.slane %v1411_v19, 2 }
 0x22a   :  { %v1364_v29 = vmul.f32 0.00048828125, %v1363_v25  ;;  %v1449_v8 = vpop.xlane.xlu1 %1448 }
 0x22b   :  { %v1407_v30 = vrot.slane %v1406_v27, 1  ;;  %v1455_v31 = vrot.slane %v1449_v8, 4  ;;  %v1413_v35 = vadd.f32 %v1412_v7, %v1411_v19 }
 0x22c   :  { %v1367_v32 = vsub.f32 %v1364_v29, %v1366_v26 }
 0x22d   :  { %v2187_v40 = vpop.eup %2186  ;;  %v1408_v41 = vadd.f32 %v1407_v30, %v1406_v27  ;;  %v1456_v42 = vadd.f32 %v1455_v31, %v1449_v8  ;;  %v1414_v11 = vrot.slane %v1413_v35, 1 }
 0x22e   :  { %v1318_v43 = vmul.f32 %v2187_v40, %v1316_v15  ;;  %v1368_v10 = vadd.f32 1e-05, %v1367_v32  ;;  %vm1324_vm3 = vweird.f32 %v2187_v40  ;;  %v1383_v32 = vstv %s2517_s24 }
 0x22f   :  { %v2506_v44 = vmul.f32 0.00048828125, %v1408_v41  ;;  %v1457_v45 = vrot.slane %v1456_v42, 2  ;;  %v1415_v47 = vadd.f32 %v1414_v11, %v1413_v35  ;;  %vm1325_vm5 = vmor %vm1323_vm4, %vm1324_vm3 }
 0x230   :  { %v1319_v46 = vmul.f32 %v2187_v40, %v1318_v43  ;;  %2188 = vrsqrt.f32 %v1368_v10  ;;  %vm1375_vm7 = vweird.f32 %v1368_v10 }
 0x231   :  { %v1418_v28 = vmul.f32 %v2506_v44, %v2506_v44  ;;  %v1458_v48 = vadd.f32 %v1457_v45, %v1456_v42  ;;  %v1416_v50 = vmul.f32 0.00048828125, %v1415_v47  ;;  %v1431_v45 = vstv %s2524_s25 }
 0x232   :  { %v1320_v49 = vmul.f32 0.5, %v1319_v46  ;;  %v1454_v61 = vpop.xlane.xlu1 %1453 }
 0x233   :  { %v1462_v51 = vrot.slane %v1454_v61, 4  ;;  %v1419_v53 = vsub.f32 %v1416_v50, %v1418_v28  ;;  %v1459_v54 = vrot.slane %v1458_v48, 1 }
 0x234   :  { %v1321_v52 = vsub.f32 1.5, %v1320_v49 }
 0x235   :  { %v1463_v55 = vadd.f32 %v1462_v51, %v1454_v61  ;;  %v1420_v62 = vadd.f32 1e-05, %v1419_v53  ;;  %v1460_v37 = vadd.f32 %v1459_v54, %v1458_v48 }
 0x236   :  { %v2189_v58 = vpop.eup %2188  ;;  %v1322_v60 = vmul.f32 %v2187_v40, %v1321_v52 }
 0x237   :  { %v1370_v0 = vmul.f32 %v2189_v58, %v1368_v10  ;;  %v1464_v1 = vrot.slane %v1463_v55, 2  ;;  %2190 = vrsqrt.f32 %v1420_v62  ;;  %vm1376_vm6 = vweird.f32 %v2189_v58 }
 0x238   :  { %v1326_v34 = vsel %vm1325_vm5, %v2187_v40, %v1322_v60  ;;  %v2519_v14 = vmul.f32 0.00048828125, %v1460_v37  ;;  %vm1377_vm8 = vmor %vm1375_vm7, %vm1376_vm6  ;;  %vm1427_vm10 = vweird.f32 %v1420_v62 }
 0x239   :  { %v1328_v2 = vmul.f32 %v1327_v59, %v1326_v34  ;;  %v1371_v3 = vmul.f32 %v2189_v58, %v1370_v0  ;;  %v1465_v4 = vadd.f32 %v1464_v1, %v1463_v55 }
 0x23a   :  { %v1470_v27 = vmul.f32 %v2519_v14, %v2519_v14 }
 0x23b   :  { %v1330_v12 = vmul.f32 %v1328_v2, %v2496_v63  ;;  %v1372_v13 = vmul.f32 0.5, %v1371_v3  ;;  %v1466_v33 = vrot.slane %v1465_v4, 1  ;;  %v1333_v15 = vmul.f32 %v1328_v2, %v2450_v56 }
 0x23c   :  { %v1334_v16 = vmul.f32 %v1328_v2, %v2452_v57 }
 0x23d   :  { %v1332_v36 = vsub.f32 %v1331_v9, %v1330_v12  ;;  %v1373_v17 = vsub.f32 1.5, %v1372_v13  ;;  %v2191_v18 = vpop.eup %2190  ;;  %v1467_v24 = vadd.f32 %v1466_v33, %v1465_v4 }
 0x23e   :  { %v1422_v26 = vmul.f32 %v2191_v18, %v1420_v62  ;;  %vm1428_vm9 = vweird.f32 %v2191_v18 }
 0x23f   :  { %v1335_v25 = vadd.f32 %v1333_v15, %v1332_v36  ;;  %v1336_v63 = vadd.f32 %v1334_v16, %v1332_v36  ;;  %v1374_v19 = vmul.f32 %v2189_v58, %v1373_v17  ;;  %v1468_v56 = vmul.f32 0.00048828125, %v1467_v24  ;;  %vm1429_vm11 = vmor %vm1427_vm10, %vm1428_vm9 }
 0x240   :  { %v1423_v8 = vmul.f32 %v2191_v18, %v1422_v26 }
 0x241   :  { %v2032_v29 = vclamps-f32 %v1335_v25, 1.0  ;;  %v2033_v57 = vclamps-f32 %v1336_v63, 1.0  ;;  %v1378_v7 = vsel %vm1377_vm8, %v2189_v58, %v1374_v19  ;;  %v1471_v31 = vsub.f32 %v1468_v56, %v1470_v27 }
 0x242   :  { %v1380_v30 = vmul.f32 %v1379_v20, %v1378_v7  ;;  %v1424_v35 = vmul.f32 0.5, %v1423_v8 }
 0x243   :  { %1341 = vst [vmem:[#allocation12] sm:$0xff] %v2032_v29  ;;  %v1472_v41 = vadd.f32 1e-05, %v1471_v31 }
 0x244   :  { %1342 = vst [vmem:[#allocation12 + $0x8] sm:$0xff] %v2033_v57  ;;  %v1382_v40 = vmul.f32 %v1380_v30, %v2500_v21  ;;  %v1425_v42 = vsub.f32 1.5, %v1424_v35  ;;  %v1385_v10 = vmul.f32 %v1380_v30, %v2462_v5  ;;  %v1386_v11 = vmul.f32 %v1380_v30, %v2464_v6 }
 0x245   :  { %2192 = vrsqrt.f32 %v1472_v41  ;;  %v1435_v21 = vstv %s2039_s26  ;;  %vm1479_vm13 = vweird.f32 %v1472_v41 }
 0x246   :  { %v1384_v43 = vsub.f32 %v1383_v32, %v1382_v40  ;;  %v1426_v46 = vmul.f32 %v2191_v18, %v1425_v42 }
 0x248   :  { %v1387_v47 = vadd.f32 %v1385_v10, %v1384_v43  ;;  %v1388_v28 = vadd.f32 %v1386_v11, %v1384_v43  ;;  %v1430_v48 = vsel %vm1429_vm11, %v2191_v18, %v1426_v46 }
 0x249   :  { %v1432_v61 = vmul.f32 %v1431_v45, %v1430_v48 }
 0x24a   :  { %v2036_v49 = vclamps-f32 %v1387_v47, 1.0  ;;  %v2037_v50 = vclamps-f32 %v1388_v28, 1.0 }
 0x24b   :  { %v2193_v51 = vpop.eup %2192  ;;  %v1434_v52 = vmul.f32 %v1432_v61, %v2506_v44  ;;  %v1437_v53 = vmul.f32 %v1432_v61, %v2474_v22  ;;  %v1438_v54 = vmul.f32 %v1432_v61, %v2476_v23  ;;  %v1483_v44 = vstv %s2042_s27 }
 0x24c   :  { %1393 = vst [vmem:[#allocation12 + $0x10] sm:$0xff] %v2036_v49  ;;  %v1474_v5 = vmul.f32 %v2193_v51, %v1472_v41  ;;  %vm1480_vm12 = vweird.f32 %v2193_v51  ;;  %v1487_v22 = vstv %s2043_s28 }
 0x24d   :  { %1394 = vst [vmem:[#allocation12 + $0x18] sm:$0xff] %v2037_v50  ;;  %v1436_v6 = vsub.f32 %v1435_v21, %v1434_v52  ;;  %vm1481_vm14 = vmor %vm1479_vm13, %vm1480_vm12 }
 0x24e   :  { %v1475_v55 = vmul.f32 %v2193_v51, %v1474_v5 }
 0x24f   :  { %v1439_v58 = vadd.f32 %v1437_v53, %v1436_v6  ;;  %v1440_v59 = vadd.f32 %v1438_v54, %v1436_v6 }
 0x250   :  { %v1476_v60 = vmul.f32 0.5, %v1475_v55 }
 0x251   :  { %v2040_v62 = vclamps-f32 %v1439_v58, 1.0  ;;  %v2041_v0 = vclamps-f32 %v1440_v59, 1.0 }
 0x252   :  { %v1477_v1 = vsub.f32 1.5, %v1476_v60 }
 0x253   :  { %1445 = vst [vmem:[#allocation12 + $0x20] sm:$0xff] %v2040_v62 }
 0x254   :  { %1446 = vst [vmem:[#allocation12 + $0x28] sm:$0xff] %v2041_v0  ;;  %v1478_v34 = vmul.f32 %v2193_v51, %v1477_v1 }
 0x256   :  { %v1482_v37 = vsel %vm1481_vm14, %v2193_v51, %v1478_v34 }
 0x257   :  { %v1484_v2 = vmul.f32 %v1483_v44, %v1482_v37 }
 0x259   :  { %v1486_v23 = vmul.f32 %v1484_v2, %v2519_v14  ;;  %v1489_v4 = vmul.f32 %v1484_v2, %v2486_v38  ;;  %v1490_v9 = vmul.f32 %v1484_v2, %v2488_v39 }
 0x25b   :  { %v1488_v3 = vsub.f32 %v1487_v22, %v1486_v23 }
 0x25d   :  { %v1491_v12 = vadd.f32 %v1489_v4, %v1488_v3  ;;  %v1492_v13 = vadd.f32 %v1490_v9, %v1488_v3 }
 0x25f   :  { %v2044_v33 = vclamps-f32 %v1491_v12, 1.0  ;;  %v2045_v36 = vclamps-f32 %v1492_v13, 1.0 }
 0x261   :  { %1497 = vst [vmem:[#allocation12 + $0x30] sm:$0xff] %v2044_v33 }
 0x262   :  { %1498 = vst [vmem:[#allocation12 + $0x38] sm:$0xff] %v2045_v36 }
 0x263   :  { %1509 = dma.vmem_to_hbm [thread:$0]  %s1505_s30, 1024, %s1507_s9, [#allocation4]  }
 0x264   :  { %2334 = dma.done.wait [#allocation4], 1024  }
 0x265   :  { %2335 = vsyncadd [#allocation4], 4294966272 }
 0x266   :  { %1514 = vsyncpa [#allocation3], 1 }
 0x267   :  { %1515 = vsyncpa [#allocation7], 1 }
 0x268   :  { %1516 = vsyncpa [#allocation10], 1 }
 0x269   :  { %1517 = vsyncpa [#allocation4], 1 }
 0x26a   :  { %1518 = vsyncpa [#allocation5], 1 }

</bundles_post_ra>
